<compile_context>
chip_gen: v7x
topology: tpu7x:2x2x1
jax: 0.10.0
libtpu: 0.0.40
codegen_flags: <defaults>
</compile_context>

<pallas_src>
import jax
import jax.numpy as jnp
from jax.experimental import pallas as pl
from jax.experimental.pallas import tpu as pltpu


def _layernorm(x, gamma, beta, eps=1e-5):
    mean = jnp.mean(x, axis=-1, keepdims=True)
    var = jnp.mean((x - mean) ** 2, axis=-1, keepdims=True)
    return (x - mean) * jax.lax.rsqrt(var + eps) * gamma + beta


def backbone_kernel(ids_ref, emb_ref, wqkv_ref, wo_ref,
                    ln1g_ref, ln1b_ref,
                    w1_ref, b1_ref, w2_ref, b2_ref,
                    ln2g_ref, ln2b_ref,
                    out_ref):
    # ids_ref block: (1, TB, S) int32 ; out_ref block: (TB, S, D) float32
    TB, S, D = out_ref.shape
    V = emb_ref.shape[0]

    ids = ids_ref[0]                                      # (TB, S) int32
    emb = emb_ref[...]                                    # (V, D)  f32

    # --- token embedding: VPU select/accumulate over the tiny DNA vocab ---
    # (avoids a mostly-masked MXU pass with a K = V = 16 contraction)
    x = jnp.zeros((TB, S, D), jnp.float32)
    for tok in range(V):                                  # V static & small
        mask = (ids == tok).astype(jnp.float32)[..., None]       # (TB, S, 1)
        x = x + mask * emb[tok][None, None, :]                    # (TB, S, D)

    x2 = x.reshape(TB * S, D)                             # rows for linears

    # --- fused QKV projection: one wide bf16 MXU pass, f32 accumulate ---
    qkv = jnp.dot(x2.astype(jnp.bfloat16), wqkv_ref[...],
                  preferred_element_type=jnp.float32)     # (TB*S, 3D)
    q = qkv[:, 0 * D:1 * D].reshape(TB, S, D)
    k = qkv[:, 1 * D:2 * D].reshape(TB, S, D)
    vv = qkv[:, 2 * D:3 * D].reshape(TB, S, D)

    # --- single-head self-attention (batched over the TB sequences) ---
    # Scale folded into q (rows x D work) instead of the (S, S) score matrix.
    scale = 1.0 / jnp.sqrt(jnp.float32(D))
    q = q * scale
    scores = jnp.einsum('bqd,bkd->bqk',
                        q.astype(jnp.bfloat16), k.astype(jnp.bfloat16),
                        preferred_element_type=jnp.float32)       # (TB, S, S)
    scores = scores - jnp.max(scores, axis=-1, keepdims=True)
    p = jnp.exp(scores)                                   # f32 softmax
    p = p * pl.reciprocal(jnp.sum(p, axis=-1, keepdims=True), approx=True)

    attn = jnp.einsum('bqk,bkd->bqd',
                      p.astype(jnp.bfloat16), vv.astype(jnp.bfloat16),
                      preferred_element_type=jnp.float32)         # (TB, S, D)
    attn2 = jnp.dot(attn.reshape(TB * S, D).astype(jnp.bfloat16), wo_ref[...],
                    preferred_element_type=jnp.float32)           # (TB*S, D)

    x2 = _layernorm(x2 + attn2, ln1g_ref[...], ln1b_ref[...])     # f32

    # --- MLP (bf16 matmuls, f32 GELU / bias / residual) ---
    h = jnp.dot(x2.astype(jnp.bfloat16), w1_ref[...],
                preferred_element_type=jnp.float32) + b1_ref[...]
    h = jax.nn.gelu(h, approximate=True)
    h = jnp.dot(h.astype(jnp.bfloat16), w2_ref[...],
                preferred_element_type=jnp.float32) + b2_ref[...]

    x2 = _layernorm(x2 + h, ln2g_ref[...], ln2b_ref[...])

    out_ref[...] = x2.reshape(TB, S, D).astype(out_ref.dtype)


def dna_embedding_forward(input_ids, params, *, batch_block=2):
    """input_ids: (B, S) int  ->  last_hidden_state: (B, S, D) float32."""
    B, S = input_ids.shape
    V, D = params["emb"].shape
    F = params["w1"].shape[1]

    TB = min(batch_block, B)
    assert B % TB == 0, "batch must be divisible by the batch block"

    # Compact ids layout: (B//TB, TB, S) so each grid step gets a (TB, S) tile
    # whose last-two dims equal the full array dims (no (S, 1) 1-lane DMA).
    ids_blocked = input_ids.astype(jnp.int32).reshape(B // TB, TB, S)

    def weight_spec(shape):
        # Full-array block, constant block index every step (invariant
        # weights -> pipeline does not re-fetch them across grid steps).
        # NOTE: for real (D~1024, F~4096) checkpoints on v7x, also consider
        # pipeline_mode=pl.Buffered(1) here to halve weight buffering.
        return pl.BlockSpec(shape, lambda g: (0,) * len(shape))

    in_specs = [
        pl.BlockSpec((1, TB, S), lambda g: (g, 0, 0)),    # ids
        weight_spec((V, D)),                              # emb (f32, tiny)
        weight_spec((D, 3 * D)),                          # fused wqkv (bf16)
        weight_spec((D, D)),                              # wo (bf16)
        weight_spec((1, D)), weight_spec((1, D)),         # ln1 gamma/beta
        weight_spec((D, F)), weight_spec((1, F)),         # w1 (bf16), b1
        weight_spec((F, D)), weight_spec((1, D)),         # w2 (bf16), b2
        weight_spec((1, D)), weight_spec((1, D)),         # ln2 gamma/beta
    ]
    out_spec = pl.BlockSpec((TB, S, D), lambda g: (g, 0, 0))  # lane-dense (D=128)

    return pl.pallas_call(
        backbone_kernel,
        out_shape=jax.ShapeDtypeStruct((B, S, D), jnp.float32),
        grid=(B // TB,),
        in_specs=in_specs,
        out_specs=out_spec,
        compiler_params=pltpu.CompilerParams(
            dimension_semantics=("parallel",),       # shards across v7x's 2 TCs
            vmem_limit_bytes=32 * 1024 * 1024),      # explicit, v7x-safe budget
    )(ids_blocked, params["emb"],
      params["wqkv"], params["wo"],
      params["ln1_g"], params["ln1_b"],
      params["w1"], params["b1"], params["w2"], params["b2"],
      params["ln2_g"], params["ln2_b"])


def dna_embedding_reference(input_ids, params):
    """Pure-JAX reference mirroring the kernel math (bf16 matmuls, f32 rest)."""
    emb = params["emb"]
    x = jnp.take(emb, input_ids.astype(jnp.int32), axis=0)      # (B, S, D)
    B, S, D = x.shape
    x2 = x.reshape(B * S, D)

    qkv = jnp.dot(x2.astype(jnp.bfloat16), params["wqkv"],
                  preferred_element_type=jnp.float32)
    q = qkv[:, 0 * D:1 * D].reshape(B, S, D)
    k = qkv[:, 1 * D:2 * D].reshape(B, S, D)
    v = qkv[:, 2 * D:3 * D].reshape(B, S, D)

    scale = 1.0 / jnp.sqrt(jnp.float32(D))
    q = q * scale                                        # scale folded into q
    s = jnp.einsum('bqd,bkd->bqk', q.astype(jnp.bfloat16), k.astype(jnp.bfloat16),
                   preferred_element_type=jnp.float32)
    p = jax.nn.softmax(s, axis=-1)
    attn = jnp.einsum('bqk,bkd->bqd', p.astype(jnp.bfloat16), v.astype(jnp.bfloat16),
                      preferred_element_type=jnp.float32).reshape(B * S, D)
    attn = jnp.dot(attn.astype(jnp.bfloat16), params["wo"],
                   preferred_element_type=jnp.float32)

    x2 = _layernorm(x2 + attn, params["ln1_g"], params["ln1_b"])
    h = jnp.dot(x2.astype(jnp.bfloat16), params["w1"],
                preferred_element_type=jnp.float32) + params["b1"]
    h = jax.nn.gelu(h, approximate=True)
    h = jnp.dot(h.astype(jnp.bfloat16), params["w2"],
                preferred_element_type=jnp.float32) + params["b2"]
    x2 = _layernorm(x2 + h, params["ln2_g"], params["ln2_b"])
    return x2.reshape(B, S, D)


def init_params(key, vocab=16, hidden=128, ffn=512):
    ks = jax.random.split(key, 6)
    s = 0.02
    f32, bf16 = jnp.float32, jnp.bfloat16
    return {
        "emb": s * jax.random.normal(ks[0], (vocab, hidden), f32),
        "wqkv": (s * jax.random.normal(ks[1], (hidden, 3 * hidden), f32)).astype(bf16),
        "wo": (s * jax.random.normal(ks[2], (hidden, hidden), f32)).astype(bf16),
        "ln1_g": jnp.ones((1, hidden), f32),
        "ln1_b": jnp.zeros((1, hidden), f32),
        "w1": (s * jax.random.normal(ks[3], (hidden, ffn), f32)).astype(bf16),
        "b1": jnp.zeros((1, ffn), f32),
        "w2": (s * jax.random.normal(ks[4], (ffn, hidden), f32)).astype(bf16),
        "b2": jnp.zeros((1, hidden), f32),
        "ln2_g": jnp.ones((1, hidden), f32),
        "ln2_b": jnp.zeros((1, hidden), f32),
    }


if __name__ == "__main__":
    key = jax.random.PRNGKey(0)
    k_ids, k_params = jax.random.split(key)

    B, S, V, D, F = 4, 8, 16, 128, 512          # lane-dense D, F = 4*D
    params = init_params(k_params, vocab=V, hidden=D, ffn=F)
    input_ids = jax.random.randint(k_ids, (B, S), 0, V, dtype=jnp.int32)

    out = dna_embedding_forward(input_ids, params, batch_block=2)
    out = jax.block_until_ready(out)
    assert out.shape == (B, S, D) and out.dtype == jnp.float32

    ref = dna_embedding_reference(input_ids, params)
    ref = jax.block_until_ready(ref)
    assert jnp.allclose(out, ref, atol=5e-2, rtol=5e-2), \
        float(jnp.max(jnp.abs(out - ref)))

    print("KERNEL_OK")
</pallas_src>

<mosaic_0001>
module attributes {stable_mosaic.version = 11 : i64} {
  func.func @backbone_kernel(%arg0: i32, %arg1: memref<1x2x8xi32, #tpu.memory_space<vmem>>, %arg2: memref<16x128xf32, #tpu.memory_space<vmem>>, %arg3: memref<128x384xbf16, #tpu.memory_space<vmem>>, %arg4: memref<128x128xbf16, #tpu.memory_space<vmem>>, %arg5: memref<1x128xf32, #tpu.memory_space<vmem>>, %arg6: memref<1x128xf32, #tpu.memory_space<vmem>>, %arg7: memref<128x512xbf16, #tpu.memory_space<vmem>>, %arg8: memref<1x512xf32, #tpu.memory_space<vmem>>, %arg9: memref<512x128xbf16, #tpu.memory_space<vmem>>, %arg10: memref<1x128xf32, #tpu.memory_space<vmem>>, %arg11: memref<1x128xf32, #tpu.memory_space<vmem>>, %arg12: memref<1x128xf32, #tpu.memory_space<vmem>>, %arg13: memref<2x8x128xf32, #tpu.memory_space<vmem>>) attributes {dimension_semantics = [#tpu.dimension_semantics<parallel>], iteration_bounds = array<i64: 2>, scalar_prefetch = 0 : i64, scratch_operands = 0 : i64, tpu.core_type = #tpu.core_type<tc>, window_params = [{transform_indices = @transform_0, window_bounds = array<i64: 1, 2, 8>}, {pipeline_mode = #tpu.pipeline_mode<synchronous>, transform_indices = @transform_1, window_bounds = array<i64: 16, 128>}, {pipeline_mode = #tpu.pipeline_mode<synchronous>, transform_indices = @transform_2, window_bounds = array<i64: 128, 384>}, {pipeline_mode = #tpu.pipeline_mode<synchronous>, transform_indices = @transform_3, window_bounds = array<i64: 128, 128>}, {pipeline_mode = #tpu.pipeline_mode<synchronous>, transform_indices = @transform_4, window_bounds = array<i64: 1, 128>}, {pipeline_mode = #tpu.pipeline_mode<synchronous>, transform_indices = @transform_5, window_bounds = array<i64: 1, 128>}, {pipeline_mode = #tpu.pipeline_mode<synchronous>, transform_indices = @transform_6, window_bounds = array<i64: 128, 512>}, {pipeline_mode = #tpu.pipeline_mode<synchronous>, transform_indices = @transform_7, window_bounds = array<i64: 1, 512>}, {pipeline_mode = #tpu.pipeline_mode<synchronous>, transform_indices = @transform_8, window_bounds = array<i64: 512, 128>}, {pipeline_mode = #tpu.pipeline_mode<synchronous>, transform_indices = @transform_9, window_bounds = array<i64: 1, 128>}, {pipeline_mode = #tpu.pipeline_mode<synchronous>, transform_indices = @transform_10, window_bounds = array<i64: 1, 128>}, {pipeline_mode = #tpu.pipeline_mode<synchronous>, transform_indices = @transform_11, window_bounds = array<i64: 1, 128>}, {transform_indices = @transform_12, window_bounds = array<i64: 2, 8, 128>}]} {
    %c0 = arith.constant 0 : index
    %c0_0 = arith.constant 0 : index
    %c0_1 = arith.constant 0 : index
    %0 = vector.load %arg1[%c0, %c0_0, %c0_1] : memref<1x2x8xi32, #tpu.memory_space<vmem>>, vector<1x2x8xi32>
    %1 = vector.shape_cast %0 : vector<1x2x8xi32> to vector<2x8xi32>
    %c0_2 = arith.constant 0 : index
    %c0_3 = arith.constant 0 : index
    %2 = vector.load %arg2[%c0_2, %c0_3] : memref<16x128xf32, #tpu.memory_space<vmem>>, vector<16x128xf32>
    %cst = arith.constant 0.000000e+00 : f32
    %3 = vector.broadcast %cst : f32 to vector<2x8x128xf32>
    %c0_i32 = arith.constant 0 : i32
    %4 = vector.broadcast %c0_i32 : i32 to vector<2x8xi32>
    %5 = arith.cmpi eq, %1, %4 : vector<2x8xi32>
    %6 = arith.extui %5 : vector<2x8xi1> to vector<2x8xi32>
    %7 = arith.sitofp %6 : vector<2x8xi32> to vector<2x8xf32>
    %8 = vector.shape_cast %7 : vector<2x8xf32> to vector<2x8x1xf32>
    %9 = vector.extract_strided_slice %2 {offsets = [0, 0], sizes = [1, 128], strides = [1, 1]} : vector<16x128xf32> to vector<1x128xf32>
    %10 = vector.shape_cast %9 : vector<1x128xf32> to vector<128xf32>
    %11 = vector.shape_cast %10 : vector<128xf32> to vector<1x1x128xf32>
    %12 = vector.broadcast %8 : vector<2x8x1xf32> to vector<2x8x128xf32>
    %13 = vector.broadcast %11 : vector<1x1x128xf32> to vector<2x8x128xf32>
    %14 = arith.mulf %12, %13 : vector<2x8x128xf32>
    %15 = arith.addf %3, %14 : vector<2x8x128xf32>
    %c1_i32 = arith.constant 1 : i32
    %16 = vector.broadcast %c1_i32 : i32 to vector<2x8xi32>
    %17 = arith.cmpi eq, %1, %16 : vector<2x8xi32>
    %18 = arith.extui %17 : vector<2x8xi1> to vector<2x8xi32>
    %19 = arith.sitofp %18 : vector<2x8xi32> to vector<2x8xf32>
    %20 = vector.shape_cast %19 : vector<2x8xf32> to vector<2x8x1xf32>
    %21 = vector.extract_strided_slice %2 {offsets = [1, 0], sizes = [1, 128], strides = [1, 1]} : vector<16x128xf32> to vector<1x128xf32>
    %22 = vector.shape_cast %21 : vector<1x128xf32> to vector<128xf32>
    %23 = vector.shape_cast %22 : vector<128xf32> to vector<1x1x128xf32>
    %24 = vector.broadcast %20 : vector<2x8x1xf32> to vector<2x8x128xf32>
    %25 = vector.broadcast %23 : vector<1x1x128xf32> to vector<2x8x128xf32>
    %26 = arith.mulf %24, %25 : vector<2x8x128xf32>
    %27 = arith.addf %15, %26 : vector<2x8x128xf32>
    %c2_i32 = arith.constant 2 : i32
    %28 = vector.broadcast %c2_i32 : i32 to vector<2x8xi32>
    %29 = arith.cmpi eq, %1, %28 : vector<2x8xi32>
    %30 = arith.extui %29 : vector<2x8xi1> to vector<2x8xi32>
    %31 = arith.sitofp %30 : vector<2x8xi32> to vector<2x8xf32>
    %32 = vector.shape_cast %31 : vector<2x8xf32> to vector<2x8x1xf32>
    %33 = vector.extract_strided_slice %2 {offsets = [2, 0], sizes = [1, 128], strides = [1, 1]} : vector<16x128xf32> to vector<1x128xf32>
    %34 = vector.shape_cast %33 : vector<1x128xf32> to vector<128xf32>
    %35 = vector.shape_cast %34 : vector<128xf32> to vector<1x1x128xf32>
    %36 = vector.broadcast %32 : vector<2x8x1xf32> to vector<2x8x128xf32>
    %37 = vector.broadcast %35 : vector<1x1x128xf32> to vector<2x8x128xf32>
    %38 = arith.mulf %36, %37 : vector<2x8x128xf32>
    %39 = arith.addf %27, %38 : vector<2x8x128xf32>
    %c3_i32 = arith.constant 3 : i32
    %40 = vector.broadcast %c3_i32 : i32 to vector<2x8xi32>
    %41 = arith.cmpi eq, %1, %40 : vector<2x8xi32>
    %42 = arith.extui %41 : vector<2x8xi1> to vector<2x8xi32>
    %43 = arith.sitofp %42 : vector<2x8xi32> to vector<2x8xf32>
    %44 = vector.shape_cast %43 : vector<2x8xf32> to vector<2x8x1xf32>
    %45 = vector.extract_strided_slice %2 {offsets = [3, 0], sizes = [1, 128], strides = [1, 1]} : vector<16x128xf32> to vector<1x128xf32>
    %46 = vector.shape_cast %45 : vector<1x128xf32> to vector<128xf32>
    %47 = vector.shape_cast %46 : vector<128xf32> to vector<1x1x128xf32>
    %48 = vector.broadcast %44 : vector<2x8x1xf32> to vector<2x8x128xf32>
    %49 = vector.broadcast %47 : vector<1x1x128xf32> to vector<2x8x128xf32>
    %50 = arith.mulf %48, %49 : vector<2x8x128xf32>
    %51 = arith.addf %39, %50 : vector<2x8x128xf32>
    %c4_i32 = arith.constant 4 : i32
    %52 = vector.broadcast %c4_i32 : i32 to vector<2x8xi32>
    %53 = arith.cmpi eq, %1, %52 : vector<2x8xi32>
    %54 = arith.extui %53 : vector<2x8xi1> to vector<2x8xi32>
    %55 = arith.sitofp %54 : vector<2x8xi32> to vector<2x8xf32>
    %56 = vector.shape_cast %55 : vector<2x8xf32> to vector<2x8x1xf32>
    %57 = vector.extract_strided_slice %2 {offsets = [4, 0], sizes = [1, 128], strides = [1, 1]} : vector<16x128xf32> to vector<1x128xf32>
    %58 = vector.shape_cast %57 : vector<1x128xf32> to vector<128xf32>
    %59 = vector.shape_cast %58 : vector<128xf32> to vector<1x1x128xf32>
    %60 = vector.broadcast %56 : vector<2x8x1xf32> to vector<2x8x128xf32>
    %61 = vector.broadcast %59 : vector<1x1x128xf32> to vector<2x8x128xf32>
    %62 = arith.mulf %60, %61 : vector<2x8x128xf32>
    %63 = arith.addf %51, %62 : vector<2x8x128xf32>
    %c5_i32 = arith.constant 5 : i32
    %64 = vector.broadcast %c5_i32 : i32 to vector<2x8xi32>
    %65 = arith.cmpi eq, %1, %64 : vector<2x8xi32>
    %66 = arith.extui %65 : vector<2x8xi1> to vector<2x8xi32>
    %67 = arith.sitofp %66 : vector<2x8xi32> to vector<2x8xf32>
    %68 = vector.shape_cast %67 : vector<2x8xf32> to vector<2x8x1xf32>
    %69 = vector.extract_strided_slice %2 {offsets = [5, 0], sizes = [1, 128], strides = [1, 1]} : vector<16x128xf32> to vector<1x128xf32>
    %70 = vector.shape_cast %69 : vector<1x128xf32> to vector<128xf32>
    %71 = vector.shape_cast %70 : vector<128xf32> to vector<1x1x128xf32>
    %72 = vector.broadcast %68 : vector<2x8x1xf32> to vector<2x8x128xf32>
    %73 = vector.broadcast %71 : vector<1x1x128xf32> to vector<2x8x128xf32>
    %74 = arith.mulf %72, %73 : vector<2x8x128xf32>
    %75 = arith.addf %63, %74 : vector<2x8x128xf32>
    %c6_i32 = arith.constant 6 : i32
    %76 = vector.broadcast %c6_i32 : i32 to vector<2x8xi32>
    %77 = arith.cmpi eq, %1, %76 : vector<2x8xi32>
    %78 = arith.extui %77 : vector<2x8xi1> to vector<2x8xi32>
    %79 = arith.sitofp %78 : vector<2x8xi32> to vector<2x8xf32>
    %80 = vector.shape_cast %79 : vector<2x8xf32> to vector<2x8x1xf32>
    %81 = vector.extract_strided_slice %2 {offsets = [6, 0], sizes = [1, 128], strides = [1, 1]} : vector<16x128xf32> to vector<1x128xf32>
    %82 = vector.shape_cast %81 : vector<1x128xf32> to vector<128xf32>
    %83 = vector.shape_cast %82 : vector<128xf32> to vector<1x1x128xf32>
    %84 = vector.broadcast %80 : vector<2x8x1xf32> to vector<2x8x128xf32>
    %85 = vector.broadcast %83 : vector<1x1x128xf32> to vector<2x8x128xf32>
    %86 = arith.mulf %84, %85 : vector<2x8x128xf32>
    %87 = arith.addf %75, %86 : vector<2x8x128xf32>
    %c7_i32 = arith.constant 7 : i32
    %88 = vector.broadcast %c7_i32 : i32 to vector<2x8xi32>
    %89 = arith.cmpi eq, %1, %88 : vector<2x8xi32>
    %90 = arith.extui %89 : vector<2x8xi1> to vector<2x8xi32>
    %91 = arith.sitofp %90 : vector<2x8xi32> to vector<2x8xf32>
    %92 = vector.shape_cast %91 : vector<2x8xf32> to vector<2x8x1xf32>
    %93 = vector.extract_strided_slice %2 {offsets = [7, 0], sizes = [1, 128], strides = [1, 1]} : vector<16x128xf32> to vector<1x128xf32>
    %94 = vector.shape_cast %93 : vector<1x128xf32> to vector<128xf32>
    %95 = vector.shape_cast %94 : vector<128xf32> to vector<1x1x128xf32>
    %96 = vector.broadcast %92 : vector<2x8x1xf32> to vector<2x8x128xf32>
    %97 = vector.broadcast %95 : vector<1x1x128xf32> to vector<2x8x128xf32>
    %98 = arith.mulf %96, %97 : vector<2x8x128xf32>
    %99 = arith.addf %87, %98 : vector<2x8x128xf32>
    %c8_i32 = arith.constant 8 : i32
    %100 = vector.broadcast %c8_i32 : i32 to vector<2x8xi32>
    %101 = arith.cmpi eq, %1, %100 : vector<2x8xi32>
    %102 = arith.extui %101 : vector<2x8xi1> to vector<2x8xi32>
    %103 = arith.sitofp %102 : vector<2x8xi32> to vector<2x8xf32>
    %104 = vector.shape_cast %103 : vector<2x8xf32> to vector<2x8x1xf32>
    %105 = vector.extract_strided_slice %2 {offsets = [8, 0], sizes = [1, 128], strides = [1, 1]} : vector<16x128xf32> to vector<1x128xf32>
    %106 = vector.shape_cast %105 : vector<1x128xf32> to vector<128xf32>
    %107 = vector.shape_cast %106 : vector<128xf32> to vector<1x1x128xf32>
    %108 = vector.broadcast %104 : vector<2x8x1xf32> to vector<2x8x128xf32>
    %109 = vector.broadcast %107 : vector<1x1x128xf32> to vector<2x8x128xf32>
    %110 = arith.mulf %108, %109 : vector<2x8x128xf32>
    %111 = arith.addf %99, %110 : vector<2x8x128xf32>
    %c9_i32 = arith.constant 9 : i32
    %112 = vector.broadcast %c9_i32 : i32 to vector<2x8xi32>
    %113 = arith.cmpi eq, %1, %112 : vector<2x8xi32>
    %114 = arith.extui %113 : vector<2x8xi1> to vector<2x8xi32>
    %115 = arith.sitofp %114 : vector<2x8xi32> to vector<2x8xf32>
    %116 = vector.shape_cast %115 : vector<2x8xf32> to vector<2x8x1xf32>
    %117 = vector.extract_strided_slice %2 {offsets = [9, 0], sizes = [1, 128], strides = [1, 1]} : vector<16x128xf32> to vector<1x128xf32>
    %118 = vector.shape_cast %117 : vector<1x128xf32> to vector<128xf32>
    %119 = vector.shape_cast %118 : vector<128xf32> to vector<1x1x128xf32>
    %120 = vector.broadcast %116 : vector<2x8x1xf32> to vector<2x8x128xf32>
    %121 = vector.broadcast %119 : vector<1x1x128xf32> to vector<2x8x128xf32>
    %122 = arith.mulf %120, %121 : vector<2x8x128xf32>
    %123 = arith.addf %111, %122 : vector<2x8x128xf32>
    %c10_i32 = arith.constant 10 : i32
    %124 = vector.broadcast %c10_i32 : i32 to vector<2x8xi32>
    %125 = arith.cmpi eq, %1, %124 : vector<2x8xi32>
    %126 = arith.extui %125 : vector<2x8xi1> to vector<2x8xi32>
    %127 = arith.sitofp %126 : vector<2x8xi32> to vector<2x8xf32>
    %128 = vector.shape_cast %127 : vector<2x8xf32> to vector<2x8x1xf32>
    %129 = vector.extract_strided_slice %2 {offsets = [10, 0], sizes = [1, 128], strides = [1, 1]} : vector<16x128xf32> to vector<1x128xf32>
    %130 = vector.shape_cast %129 : vector<1x128xf32> to vector<128xf32>
    %131 = vector.shape_cast %130 : vector<128xf32> to vector<1x1x128xf32>
    %132 = vector.broadcast %128 : vector<2x8x1xf32> to vector<2x8x128xf32>
    %133 = vector.broadcast %131 : vector<1x1x128xf32> to vector<2x8x128xf32>
    %134 = arith.mulf %132, %133 : vector<2x8x128xf32>
    %135 = arith.addf %123, %134 : vector<2x8x128xf32>
    %c11_i32 = arith.constant 11 : i32
    %136 = vector.broadcast %c11_i32 : i32 to vector<2x8xi32>
    %137 = arith.cmpi eq, %1, %136 : vector<2x8xi32>
    %138 = arith.extui %137 : vector<2x8xi1> to vector<2x8xi32>
    %139 = arith.sitofp %138 : vector<2x8xi32> to vector<2x8xf32>
    %140 = vector.shape_cast %139 : vector<2x8xf32> to vector<2x8x1xf32>
    %141 = vector.extract_strided_slice %2 {offsets = [11, 0], sizes = [1, 128], strides = [1, 1]} : vector<16x128xf32> to vector<1x128xf32>
    %142 = vector.shape_cast %141 : vector<1x128xf32> to vector<128xf32>
    %143 = vector.shape_cast %142 : vector<128xf32> to vector<1x1x128xf32>
    %144 = vector.broadcast %140 : vector<2x8x1xf32> to vector<2x8x128xf32>
    %145 = vector.broadcast %143 : vector<1x1x128xf32> to vector<2x8x128xf32>
    %146 = arith.mulf %144, %145 : vector<2x8x128xf32>
    %147 = arith.addf %135, %146 : vector<2x8x128xf32>
    %c12_i32 = arith.constant 12 : i32
    %148 = vector.broadcast %c12_i32 : i32 to vector<2x8xi32>
    %149 = arith.cmpi eq, %1, %148 : vector<2x8xi32>
    %150 = arith.extui %149 : vector<2x8xi1> to vector<2x8xi32>
    %151 = arith.sitofp %150 : vector<2x8xi32> to vector<2x8xf32>
    %152 = vector.shape_cast %151 : vector<2x8xf32> to vector<2x8x1xf32>
    %153 = vector.extract_strided_slice %2 {offsets = [12, 0], sizes = [1, 128], strides = [1, 1]} : vector<16x128xf32> to vector<1x128xf32>
    %154 = vector.shape_cast %153 : vector<1x128xf32> to vector<128xf32>
    %155 = vector.shape_cast %154 : vector<128xf32> to vector<1x1x128xf32>
    %156 = vector.broadcast %152 : vector<2x8x1xf32> to vector<2x8x128xf32>
    %157 = vector.broadcast %155 : vector<1x1x128xf32> to vector<2x8x128xf32>
    %158 = arith.mulf %156, %157 : vector<2x8x128xf32>
    %159 = arith.addf %147, %158 : vector<2x8x128xf32>
    %c13_i32 = arith.constant 13 : i32
    %160 = vector.broadcast %c13_i32 : i32 to vector<2x8xi32>
    %161 = arith.cmpi eq, %1, %160 : vector<2x8xi32>
    %162 = arith.extui %161 : vector<2x8xi1> to vector<2x8xi32>
    %163 = arith.sitofp %162 : vector<2x8xi32> to vector<2x8xf32>
    %164 = vector.shape_cast %163 : vector<2x8xf32> to vector<2x8x1xf32>
    %165 = vector.extract_strided_slice %2 {offsets = [13, 0], sizes = [1, 128], strides = [1, 1]} : vector<16x128xf32> to vector<1x128xf32>
    %166 = vector.shape_cast %165 : vector<1x128xf32> to vector<128xf32>
    %167 = vector.shape_cast %166 : vector<128xf32> to vector<1x1x128xf32>
    %168 = vector.broadcast %164 : vector<2x8x1xf32> to vector<2x8x128xf32>
    %169 = vector.broadcast %167 : vector<1x1x128xf32> to vector<2x8x128xf32>
    %170 = arith.mulf %168, %169 : vector<2x8x128xf32>
    %171 = arith.addf %159, %170 : vector<2x8x128xf32>
    %c14_i32 = arith.constant 14 : i32
    %172 = vector.broadcast %c14_i32 : i32 to vector<2x8xi32>
    %173 = arith.cmpi eq, %1, %172 : vector<2x8xi32>
    %174 = arith.extui %173 : vector<2x8xi1> to vector<2x8xi32>
    %175 = arith.sitofp %174 : vector<2x8xi32> to vector<2x8xf32>
    %176 = vector.shape_cast %175 : vector<2x8xf32> to vector<2x8x1xf32>
    %177 = vector.extract_strided_slice %2 {offsets = [14, 0], sizes = [1, 128], strides = [1, 1]} : vector<16x128xf32> to vector<1x128xf32>
    %178 = vector.shape_cast %177 : vector<1x128xf32> to vector<128xf32>
    %179 = vector.shape_cast %178 : vector<128xf32> to vector<1x1x128xf32>
    %180 = vector.broadcast %176 : vector<2x8x1xf32> to vector<2x8x128xf32>
    %181 = vector.broadcast %179 : vector<1x1x128xf32> to vector<2x8x128xf32>
    %182 = arith.mulf %180, %181 : vector<2x8x128xf32>
    %183 = arith.addf %171, %182 : vector<2x8x128xf32>
    %c15_i32 = arith.constant 15 : i32
    %184 = vector.broadcast %c15_i32 : i32 to vector<2x8xi32>
    %185 = arith.cmpi eq, %1, %184 : vector<2x8xi32>
    %186 = arith.extui %185 : vector<2x8xi1> to vector<2x8xi32>
    %187 = arith.sitofp %186 : vector<2x8xi32> to vector<2x8xf32>
    %188 = vector.shape_cast %187 : vector<2x8xf32> to vector<2x8x1xf32>
    %189 = vector.extract_strided_slice %2 {offsets = [15, 0], sizes = [1, 128], strides = [1, 1]} : vector<16x128xf32> to vector<1x128xf32>
    %190 = vector.shape_cast %189 : vector<1x128xf32> to vector<128xf32>
    %191 = vector.shape_cast %190 : vector<128xf32> to vector<1x1x128xf32>
    %192 = vector.broadcast %188 : vector<2x8x1xf32> to vector<2x8x128xf32>
    %193 = vector.broadcast %191 : vector<1x1x128xf32> to vector<2x8x128xf32>
    %194 = arith.mulf %192, %193 : vector<2x8x128xf32>
    %195 = arith.addf %183, %194 : vector<2x8x128xf32>
    %196 = vector.shape_cast %195 : vector<2x8x128xf32> to vector<16x128xf32>
    %197 = arith.truncf %196 : vector<16x128xf32> to vector<16x128xbf16>
    %c0_4 = arith.constant 0 : index
    %c0_5 = arith.constant 0 : index
    %198 = vector.load %arg3[%c0_4, %c0_5] : memref<128x384xbf16, #tpu.memory_space<vmem>>, vector<128x384xbf16>
    %cst_6 = arith.constant dense<0.000000e+00> : vector<16x384xf32>
    %199 = tpu.matmul %197, %198, %cst_6 {dimension_numbers = #tpu.dot_dimension_numbers<[1], [0], [0], [1], [0, 0, 1, 1], [], []>} : vector<16x128xbf16>, vector<128x384xbf16>, vector<16x384xf32> -> vector<16x384xf32>
    %200 = vector.extract_strided_slice %199 {offsets = [0, 0], sizes = [16, 128], strides = [1, 1]} : vector<16x384xf32> to vector<16x128xf32>
    %201 = vector.shape_cast %200 : vector<16x128xf32> to vector<2x8x128xf32>
    %202 = vector.extract_strided_slice %199 {offsets = [0, 128], sizes = [16, 128], strides = [1, 1]} : vector<16x384xf32> to vector<16x128xf32>
    %203 = vector.shape_cast %202 : vector<16x128xf32> to vector<2x8x128xf32>
    %204 = vector.extract_strided_slice %199 {offsets = [0, 256], sizes = [16, 128], strides = [1, 1]} : vector<16x384xf32> to vector<16x128xf32>
    %205 = vector.shape_cast %204 : vector<16x128xf32> to vector<2x8x128xf32>
    %cst_7 = arith.constant 1.280000e+02 : f32
    %206 = math.sqrt %cst_7 : f32
    %cst_8 = arith.constant 1.000000e+00 : f32
    %207 = arith.divf %cst_8, %206 : f32
    %208 = vector.broadcast %207 : f32 to vector<2x8x128xf32>
    %209 = arith.mulf %201, %208 : vector<2x8x128xf32>
    %210 = arith.truncf %209 : vector<2x8x128xf32> to vector<2x8x128xbf16>
    %211 = arith.truncf %203 : vector<2x8x128xf32> to vector<2x8x128xbf16>
    "tpu.trace_start"() <{level = 10 : i32, message = "bqd,bkd->bqk"}> : () -> ()
    %cst_9 = arith.constant dense<0.000000e+00> : vector<2x8x8xf32>
    %212 = tpu.matmul %210, %211, %cst_9 {dimension_numbers = #tpu.dot_dimension_numbers<[2], [2], [1], [1], [0, 0, 0, 1, 1, 1], [0], [0]>} : vector<2x8x128xbf16>, vector<2x8x128xbf16>, vector<2x8x8xf32> -> vector<2x8x8xf32>
    "tpu.trace_stop"() : () -> ()
    %cst_10 = arith.constant dense<0xFF800000> : vector<2x8xf32>
    %213 = vector.multi_reduction <maximumf>, %212, %cst_10 [2] : vector<2x8x8xf32> to vector<2x8xf32>
    %214 = vector.shape_cast %213 : vector<2x8xf32> to vector<2x8x1xf32>
    %215 = vector.broadcast %214 : vector<2x8x1xf32> to vector<2x8x8xf32>
    %216 = arith.subf %212, %215 : vector<2x8x8xf32>
    %217 = math.exp %216 : vector<2x8x8xf32>
    %cst_11 = arith.constant dense<0.000000e+00> : vector<2x8xf32>
    %218 = vector.multi_reduction <add>, %217, %cst_11 [2] : vector<2x8x8xf32> to vector<2x8xf32>
    %219 = vector.shape_cast %218 : vector<2x8xf32> to vector<2x8x1xf32>
    %220 = tpu.reciprocal %219 {approx = true} : vector<2x8x1xf32> -> vector<2x8x1xf32>
    %221 = vector.broadcast %220 : vector<2x8x1xf32> to vector<2x8x8xf32>
    %222 = arith.mulf %217, %221 : vector<2x8x8xf32>
    %223 = arith.truncf %222 : vector<2x8x8xf32> to vector<2x8x8xbf16>
    %224 = arith.truncf %205 : vector<2x8x128xf32> to vector<2x8x128xbf16>
    "tpu.trace_start"() <{level = 10 : i32, message = "bqk,bkd->bqd"}> : () -> ()
    %cst_12 = arith.constant dense<0.000000e+00> : vector<2x8x128xf32>
    %225 = tpu.matmul %223, %224, %cst_12 {dimension_numbers = #tpu.dot_dimension_numbers<[2], [1], [1], [2], [0, 0, 0, 1, 1, 2], [0], [0]>} : vector<2x8x8xbf16>, vector<2x8x128xbf16>, vector<2x8x128xf32> -> vector<2x8x128xf32>
    "tpu.trace_stop"() : () -> ()
    %226 = vector.shape_cast %225 : vector<2x8x128xf32> to vector<16x128xf32>
    %227 = arith.truncf %226 : vector<16x128xf32> to vector<16x128xbf16>
    %c0_13 = arith.constant 0 : index
    %c0_14 = arith.constant 0 : index
    %228 = vector.load %arg4[%c0_13, %c0_14] : memref<128x128xbf16, #tpu.memory_space<vmem>>, vector<128x128xbf16>
    %cst_15 = arith.constant dense<0.000000e+00> : vector<16x128xf32>
    %229 = tpu.matmul %227, %228, %cst_15 {dimension_numbers = #tpu.dot_dimension_numbers<[1], [0], [0], [1], [0, 0, 1, 1], [], []>} : vector<16x128xbf16>, vector<128x128xbf16>, vector<16x128xf32> -> vector<16x128xf32>
    %230 = arith.addf %196, %229 : vector<16x128xf32>
    %c0_16 = arith.constant 0 : index
    %c0_17 = arith.constant 0 : index
    %231 = vector.load %arg5[%c0_16, %c0_17] : memref<1x128xf32, #tpu.memory_space<vmem>>, vector<1x128xf32>
    %c0_18 = arith.constant 0 : index
    %c0_19 = arith.constant 0 : index
    %232 = vector.load %arg6[%c0_18, %c0_19] : memref<1x128xf32, #tpu.memory_space<vmem>>, vector<1x128xf32>
    %cst_20 = arith.constant dense<0.000000e+00> : vector<16xf32>
    %233 = vector.multi_reduction <add>, %230, %cst_20 [1] : vector<16x128xf32> to vector<16xf32>
    %234 = vector.shape_cast %233 : vector<16xf32> to vector<16x1xf32>
    %cst_21 = arith.constant 1.280000e+02 : f32
    %235 = vector.broadcast %cst_21 : f32 to vector<16x1xf32>
    %236 = arith.divf %234, %235 : vector<16x1xf32>
    %237 = vector.broadcast %236 : vector<16x1xf32> to vector<16x128xf32>
    %238 = arith.subf %230, %237 : vector<16x128xf32>
    %239 = arith.mulf %238, %238 : vector<16x128xf32>
    %cst_22 = arith.constant dense<0.000000e+00> : vector<16xf32>
    %240 = vector.multi_reduction <add>, %239, %cst_22 [1] : vector<16x128xf32> to vector<16xf32>
    %241 = vector.shape_cast %240 : vector<16xf32> to vector<16x1xf32>
    %cst_23 = arith.constant 1.280000e+02 : f32
    %242 = vector.broadcast %cst_23 : f32 to vector<16x1xf32>
    %243 = arith.divf %241, %242 : vector<16x1xf32>
    %244 = vector.broadcast %236 : vector<16x1xf32> to vector<16x128xf32>
    %245 = arith.subf %230, %244 : vector<16x128xf32>
    %cst_24 = arith.constant 9.99999974E-6 : f32
    %246 = vector.broadcast %cst_24 : f32 to vector<16x1xf32>
    %247 = arith.addf %243, %246 : vector<16x1xf32>
    %248 = math.rsqrt %247 : vector<16x1xf32>
    %249 = vector.broadcast %248 : vector<16x1xf32> to vector<16x128xf32>
    %250 = arith.mulf %245, %249 : vector<16x128xf32>
    %251 = vector.broadcast %231 : vector<1x128xf32> to vector<16x128xf32>
    %252 = arith.mulf %250, %251 : vector<16x128xf32>
    %253 = vector.broadcast %232 : vector<1x128xf32> to vector<16x128xf32>
    %254 = arith.addf %252, %253 : vector<16x128xf32>
    %255 = arith.truncf %254 : vector<16x128xf32> to vector<16x128xbf16>
    %c0_25 = arith.constant 0 : index
    %c0_26 = arith.constant 0 : index
    %256 = vector.load %arg7[%c0_25, %c0_26] : memref<128x512xbf16, #tpu.memory_space<vmem>>, vector<128x512xbf16>
    %cst_27 = arith.constant dense<0.000000e+00> : vector<16x512xf32>
    %257 = tpu.matmul %255, %256, %cst_27 {dimension_numbers = #tpu.dot_dimension_numbers<[1], [0], [0], [1], [0, 0, 1, 1], [], []>} : vector<16x128xbf16>, vector<128x512xbf16>, vector<16x512xf32> -> vector<16x512xf32>
    %c0_28 = arith.constant 0 : index
    %c0_29 = arith.constant 0 : index
    %258 = vector.load %arg8[%c0_28, %c0_29] : memref<1x512xf32, #tpu.memory_space<vmem>>, vector<1x512xf32>
    %259 = vector.broadcast %258 : vector<1x512xf32> to vector<16x512xf32>
    %260 = arith.addf %257, %259 : vector<16x512xf32>
    %261 = arith.mulf %260, %260 : vector<16x512xf32>
    %262 = arith.mulf %260, %261 : vector<16x512xf32>
    %cst_30 = arith.constant 4.471500e-02 : f32
    %263 = vector.broadcast %cst_30 : f32 to vector<16x512xf32>
    %264 = arith.mulf %263, %262 : vector<16x512xf32>
    %265 = arith.addf %260, %264 : vector<16x512xf32>
    %cst_31 = arith.constant 0.797884583 : f32
    %266 = vector.broadcast %cst_31 : f32 to vector<16x512xf32>
    %267 = arith.mulf %266, %265 : vector<16x512xf32>
    %268 = math.tanh %267 : vector<16x512xf32>
    %cst_32 = arith.constant 1.000000e+00 : f32
    %269 = vector.broadcast %cst_32 : f32 to vector<16x512xf32>
    %270 = arith.addf %269, %268 : vector<16x512xf32>
    %cst_33 = arith.constant 5.000000e-01 : f32
    %271 = vector.broadcast %cst_33 : f32 to vector<16x512xf32>
    %272 = arith.mulf %271, %270 : vector<16x512xf32>
    %273 = arith.mulf %260, %272 : vector<16x512xf32>
    %274 = arith.truncf %273 : vector<16x512xf32> to vector<16x512xbf16>
    %c0_34 = arith.constant 0 : index
    %c0_35 = arith.constant 0 : index
    %275 = vector.load %arg9[%c0_34, %c0_35] : memref<512x128xbf16, #tpu.memory_space<vmem>>, vector<512x128xbf16>
    %cst_36 = arith.constant dense<0.000000e+00> : vector<16x128xf32>
    %276 = tpu.matmul %274, %275, %cst_36 {dimension_numbers = #tpu.dot_dimension_numbers<[1], [0], [0], [1], [0, 0, 1, 1], [], []>} : vector<16x512xbf16>, vector<512x128xbf16>, vector<16x128xf32> -> vector<16x128xf32>
    %c0_37 = arith.constant 0 : index
    %c0_38 = arith.constant 0 : index
    %277 = vector.load %arg10[%c0_37, %c0_38] : memref<1x128xf32, #tpu.memory_space<vmem>>, vector<1x128xf32>
    %278 = vector.broadcast %277 : vector<1x128xf32> to vector<16x128xf32>
    %279 = arith.addf %276, %278 : vector<16x128xf32>
    %280 = arith.addf %254, %279 : vector<16x128xf32>
    %c0_39 = arith.constant 0 : index
    %c0_40 = arith.constant 0 : index
    %281 = vector.load %arg11[%c0_39, %c0_40] : memref<1x128xf32, #tpu.memory_space<vmem>>, vector<1x128xf32>
    %c0_41 = arith.constant 0 : index
    %c0_42 = arith.constant 0 : index
    %282 = vector.load %arg12[%c0_41, %c0_42] : memref<1x128xf32, #tpu.memory_space<vmem>>, vector<1x128xf32>
    %cst_43 = arith.constant dense<0.000000e+00> : vector<16xf32>
    %283 = vector.multi_reduction <add>, %280, %cst_43 [1] : vector<16x128xf32> to vector<16xf32>
    %284 = vector.shape_cast %283 : vector<16xf32> to vector<16x1xf32>
    %cst_44 = arith.constant 1.280000e+02 : f32
    %285 = vector.broadcast %cst_44 : f32 to vector<16x1xf32>
    %286 = arith.divf %284, %285 : vector<16x1xf32>
    %287 = vector.broadcast %286 : vector<16x1xf32> to vector<16x128xf32>
    %288 = arith.subf %280, %287 : vector<16x128xf32>
    %289 = arith.mulf %288, %288 : vector<16x128xf32>
    %cst_45 = arith.constant dense<0.000000e+00> : vector<16xf32>
    %290 = vector.multi_reduction <add>, %289, %cst_45 [1] : vector<16x128xf32> to vector<16xf32>
    %291 = vector.shape_cast %290 : vector<16xf32> to vector<16x1xf32>
    %cst_46 = arith.constant 1.280000e+02 : f32
    %292 = vector.broadcast %cst_46 : f32 to vector<16x1xf32>
    %293 = arith.divf %291, %292 : vector<16x1xf32>
    %294 = vector.broadcast %286 : vector<16x1xf32> to vector<16x128xf32>
    %295 = arith.subf %280, %294 : vector<16x128xf32>
    %cst_47 = arith.constant 9.99999974E-6 : f32
    %296 = vector.broadcast %cst_47 : f32 to vector<16x1xf32>
    %297 = arith.addf %293, %296 : vector<16x1xf32>
    %298 = math.rsqrt %297 : vector<16x1xf32>
    %299 = vector.broadcast %298 : vector<16x1xf32> to vector<16x128xf32>
    %300 = arith.mulf %295, %299 : vector<16x128xf32>
    %301 = vector.broadcast %281 : vector<1x128xf32> to vector<16x128xf32>
    %302 = arith.mulf %300, %301 : vector<16x128xf32>
    %303 = vector.broadcast %282 : vector<1x128xf32> to vector<16x128xf32>
    %304 = arith.addf %302, %303 : vector<16x128xf32>
    %305 = vector.shape_cast %304 : vector<16x128xf32> to vector<2x8x128xf32>
    %c0_48 = arith.constant 0 : index
    %c0_49 = arith.constant 0 : index
    %c0_50 = arith.constant 0 : index
    %306 = vector.load %arg13[%c0_48, %c0_49, %c0_50] : memref<2x8x128xf32, #tpu.memory_space<vmem>>, vector<2x8x128xf32>
    tpu.vector_store %arg13[%c0_48, %c0_49, %c0_50], %305 {strides = array<i32>} : memref<2x8x128xf32, #tpu.memory_space<vmem>>, vector<2x8x128xf32>,
    return
  }
  func.func @transform_0(%arg0: i32) -> (i32, i32, i32) {
    %c0_i32 = arith.constant 0 : i32
    %c0_i32_0 = arith.constant 0 : i32
    %c0_i32_1 = arith.constant 0 : i32
    return %arg0, %c0_i32, %c0_i32_0 : i32, i32, i32
  }
  func.func @transform_1(%arg0: i32) -> (i32, i32) {
    %c0_i32 = arith.constant 0 : i32
    %c0_i32_0 = arith.constant 0 : i32
    %c0_i32_1 = arith.constant 0 : i32
    return %c0_i32, %c0_i32_0 : i32, i32
  }
  func.func @transform_2(%arg0: i32) -> (i32, i32) {
    %c0_i32 = arith.constant 0 : i32
    %c0_i32_0 = arith.constant 0 : i32
    %c0_i32_1 = arith.constant 0 : i32
    return %c0_i32, %c0_i32_0 : i32, i32
  }
  func.func @transform_3(%arg0: i32) -> (i32, i32) {
    %c0_i32 = arith.constant 0 : i32
    %c0_i32_0 = arith.constant 0 : i32
    %c0_i32_1 = arith.constant 0 : i32
    return %c0_i32, %c0_i32_0 : i32, i32
  }
  func.func @transform_4(%arg0: i32) -> (i32, i32) {
    %c0_i32 = arith.constant 0 : i32
    %c0_i32_0 = arith.constant 0 : i32
    %c0_i32_1 = arith.constant 0 : i32
    return %c0_i32, %c0_i32_0 : i32, i32
  }
  func.func @transform_5(%arg0: i32) -> (i32, i32) {
    %c0_i32 = arith.constant 0 : i32
    %c0_i32_0 = arith.constant 0 : i32
    %c0_i32_1 = arith.constant 0 : i32
    return %c0_i32, %c0_i32_0 : i32, i32
  }
  func.func @transform_6(%arg0: i32) -> (i32, i32) {
    %c0_i32 = arith.constant 0 : i32
    %c0_i32_0 = arith.constant 0 : i32
    %c0_i32_1 = arith.constant 0 : i32
    return %c0_i32, %c0_i32_0 : i32, i32
  }
  func.func @transform_7(%arg0: i32) -> (i32, i32) {
    %c0_i32 = arith.constant 0 : i32
    %c0_i32_0 = arith.constant 0 : i32
    %c0_i32_1 = arith.constant 0 : i32
    return %c0_i32, %c0_i32_0 : i32, i32
  }
  func.func @transform_8(%arg0: i32) -> (i32, i32) {
    %c0_i32 = arith.constant 0 : i32
    %c0_i32_0 = arith.constant 0 : i32
    %c0_i32_1 = arith.constant 0 : i32
    return %c0_i32, %c0_i32_0 : i32, i32
  }
  func.func @transform_9(%arg0: i32) -> (i32, i32) {
    %c0_i32 = arith.constant 0 : i32
    %c0_i32_0 = arith.constant 0 : i32
    %c0_i32_1 = arith.constant 0 : i32
    return %c0_i32, %c0_i32_0 : i32, i32
  }
  func.func @transform_10(%arg0: i32) -> (i32, i32) {
    %c0_i32 = arith.constant 0 : i32
    %c0_i32_0 = arith.constant 0 : i32
    %c0_i32_1 = arith.constant 0 : i32
    return %c0_i32, %c0_i32_0 : i32, i32
  }
  func.func @transform_11(%arg0: i32) -> (i32, i32) {
    %c0_i32 = arith.constant 0 : i32
    %c0_i32_0 = arith.constant 0 : i32
    %c0_i32_1 = arith.constant 0 : i32
    return %c0_i32, %c0_i32_0 : i32, i32
  }
  func.func @transform_12(%arg0: i32) -> (i32, i32, i32) {
    %c0_i32 = arith.constant 0 : i32
    %c0_i32_0 = arith.constant 0 : i32
    %c0_i32_1 = arith.constant 0 : i32
    return %arg0, %c0_i32, %c0_i32_0 : i32, i32, i32
  }
}

</mosaic_0001>

<bundles_post_ra>
// kernel: tpu_custom_call.1
= control target key start
LH: loop header
LB: loop body
LE: loop exit
PB: predicated region body
PF: predicated region fallthrough
CT: control target
= control target key end

     0   :  { %s3839_s0 = inlined_call_operand.hbm [shape: s32[2,2,8], index: 0, kind: input, shape index: {}]   ;;  %s3840_s1 = inlined_call_operand.hbm [shape: f32[16,128], index: 1, kind: input, shape index: {}]   ;;  %s3841_s2 = inlined_call_operand.hbm [shape: bf16[128,384], index: 2, kind: input, shape index: {}]   ;;  %s3842_s3 = inlined_call_operand.hbm [shape: bf16[128,128], index: 3, kind: input, shape index: {}]   ;;  %s3843_s4 = inlined_call_operand.vmem [shape: f32[1,128], index: 4, kind: input, shape index: {}]   ;;  %s3844_s5 = inlined_call_operand.vmem [shape: f32[1,128], index: 5, kind: input, shape index: {}]   ;;  %s3845_s6 = inlined_call_operand.hbm [shape: bf16[128,512], index: 6, kind: input, shape index: {}]   ;;  %s3846_s7 = inlined_call_operand.vmem [shape: f32[1,512], index: 7, kind: input, shape index: {}]   ;;  %s3847_s8 = inlined_call_operand.hbm [shape: bf16[512,128], index: 8, kind: input, shape index: {}]   ;;  %s3848_s9 = inlined_call_operand.vmem [shape: f32[1,128], index: 9, kind: input, shape index: {}]   ;;  %s3849_s10 = inlined_call_operand.vmem [shape: f32[1,128], index: 10, kind: input, shape index: {}]   ;;  %s3850_s11 = inlined_call_operand.vmem [shape: f32[1,128], index: 11, kind: input, shape index: {}]   ;;  %s3851_s12 = inlined_call_operand.hbm [shape: f32[4,8,128], index: 12, kind: output, shape index: {}]  }
   0x1   :  { %3858 = sst [smem:[#allocation19_spill]] %s3839_s0 }
   0x2   :  { %3859 = sst [smem:[#allocation20_spill]] %s3848_s9 }
   0x3   :  { %3860 = sst [smem:[#allocation21_spill]] %s3849_s10 }
   0x4   :  { %3861 = sst [smem:[#allocation22_spill]] %s3850_s11 }
   0x5   :  { %3862 = sst [smem:[#allocation23_spill]] %s3851_s12 }
   0x6   :  { %17 = vsyncpa [#allocation3], 0 }
   0x7   :  { %19 = vsyncpa [#allocation3 + $0x1], 0 }
   0x8   :  { %20 = vsyncpa [#allocation6], 0 }
   0x9   :  { %21 = vsyncpa [#allocation9], 0 }
   0xa   :  { %22 = vsyncpa [#allocation12], 0 }
   0xb   :  { %23 = vsyncpa [#allocation4], 0 }
   0xc   :  { %25 = vsyncpa [#allocation4 + $0x1], 0  ;;  %s3282_s21 = smov 0   ;;  %s3284_s22 = smov 0  }
   0xd   :  { %s3286_s23 = smov 0   ;;  %s3288_s24 = smov 0  }
   0xe LB: > { %s3197_s25 = smov [#allocation5]   ;;  %s3303_s27 = sadd.s32 4294967295, %s3195_s24   ;;  %s3195_s24 = sphi %s3288_s24, %s3891_s24   ;;  %s3191_s23 = sphi %s3286_s23, %s3890_s23   ;;  %s3187_s22 = sphi %s3284_s22, %s3889_s22   ;;  %s3183_s21 = sphi %s3282_s21, %s3888_s21  }
   0xf   : > { %s331_s26 = sshll.u32 %s3197_s25, 4  ;;  %p2409_p0 = scmp.ge.s32.totalorder %s3195_s24, 1  ;;  %s3308_s26 = int_to_ptr.vmem [resolvable:$true] %s331_s26 }
  0x10   : > { %p3853_p1 = scmp.eq.s32.totalorder %s3303_s27, 0  ;;  %p319_p2 = scmp.lt.s32.totalorder %s3195_s24, 3 }
  0x11   : > { %s3198_s29 = smov [#allocation8]   ;;  %s3199_s14 = smov [#allocation7]  }
  0x12   : > { %p3310_p3 = pnand %p2409_p0, %p319_p2  ;;  %s357_s30 = sshll.u32 %s3198_s29, 4  ;;  %s3323_s30 = int_to_ptr.vmem [resolvable:$true] %s357_s30 }
  0x13   : > { %s3325_s15 = sshll.u32 %s3199_s14, 4  ;;  %s2947_s18 = scalar_lea.hbm %s3840_s1, 256  ;;  %s345_s15 = int_to_ptr.vmem [resolvable:$true] %s3325_s15 }
  0x14   : > { %s3863_s28 = scalar_select %p3310_p3, 1, 0 }
  0x15   : > { %p2709_p5 = pneg %p3310_p3  ;;  %p2948_p7 = scmp.ne.s32.totalorder %s3840_s1, %s2947_s18 }
  0x16   : > { %p2954_p11 = scmp.lt.u32.totalorder %s2947_s18, %s3840_s1 }
  0x17   : > { %p3319_p6 = pnand %p2709_p5, %p3853_p1 }
  0x19   : > { %p3335_p8 = pneg %p3319_p6 }
  0x1b   : > { %p2950_p9 = pnand %p3335_p8, %p2948_p7 }
  0x1d   : > { %p2951_p10 = pneg %p2950_p9 }
  0x1f   : > { %p2956_p12 = pnand %p2954_p11, %p2951_p10 }
  0x21   : > { %2959 = shalt.err (!%p2956_p12)
}
  0x22   : > { %s2960_s16 = scalar_lea.vmem %s3308_s26, 256  ;;  %p2968_p5 = scmp.lt.s32.totalorder %s3308_s26, %s3308_s26 }
  0x23   : > { %p2961_p13 = scmp.ne.s32.totalorder %s3308_s26, %s2960_s16  ;;  %p2969_p4 = scmp.lt.s32.totalorder %s2960_s16, %s2960_s16 }
  0x25   : > { %p2963_p0 = pnand %p2961_p13, %p3335_p8  ;;  %p2970_p7 = por %p2969_p4, %p2968_p5 }
  0x27   : > { %p2964_p2 = pneg %p2963_p0 }
  0x29   : > { %p2971_p9 = pnand %p2970_p7, %p2964_p2 }
  0x2b   : > { %2974 = shalt.err (!%p2971_p9)
}
  0x2c   : > { %s3200_s17 = smov 128   ;;  %s3201_s18 = smov 8  }
  0x2d   : > { %2712 = dma.hbm_to_vmem [thread:$0]  (!%p3319_p6), %s3840_s1, 256, %s3308_s26, [#allocation6], %s3200_s17, %s3200_s17, %s3201_s18  }
  0x2e   : > { %s2975_s12 = scalar_lea.hbm %s3842_s3, 1024 }
  0x2f   : > { %p2976_p4 = scmp.ne.s32.totalorder %s3842_s3, %s2975_s12  ;;  %p2982_p12 = scmp.lt.u32.totalorder %s2975_s12, %s3842_s3 }
  0x31   : > { %p2978_p10 = pnand %p2976_p4, %p3335_p8 }
  0x33   : > { %p2979_p11 = pneg %p2978_p10 }
  0x35   : > { %p2984_p13 = pnand %p2982_p12, %p2979_p11 }
  0x37   : > { %2987 = shalt.err (!%p2984_p13)
}
  0x38   : > { %s2988_s26 = scalar_lea.vmem %s3323_s30, 1024  ;;  %p2996_p7 = scmp.lt.s32.totalorder %s3323_s30, %s3323_s30 }
  0x39   : > { %p2989_p0 = scmp.ne.s32.totalorder %s3323_s30, %s2988_s26  ;;  %p2997_p9 = scmp.lt.s32.totalorder %s2988_s26, %s2988_s26 }
  0x3b   : > { %p2991_p2 = pnand %p2989_p0, %p3335_p8  ;;  %p2998_p4 = por %p2997_p9, %p2996_p7 }
  0x3d   : > { %p2992_p5 = pneg %p2991_p2 }
  0x3f   : > { %p2999_p10 = pnand %p2998_p4, %p2992_p5 }
  0x41   : > { %3002 = shalt.err (!%p2999_p10)
}
  0x42   : > { %s3855_s10 = smov 64   ;;  %s3856_s9 = smov 4  }
  0x43   : > { %2718 = dma.hbm_to_vmem [thread:$0]  (!%p3319_p6), %s3842_s3, 1024, %s3323_s30, [#allocation9], %s3855_s10, %s3855_s10, %s3856_s9  }
  0x44   : > { %s3003_s19 = scalar_lea.hbm %s3841_s2, 3072 }
  0x45   : > { %p3004_p11 = scmp.ne.s32.totalorder %s3841_s2, %s3003_s19  ;;  %p3010_p0 = scmp.lt.u32.totalorder %s3003_s19, %s3841_s2 }
  0x47   : > { %p3006_p12 = pnand %p3004_p11, %p3335_p8 }
  0x49   : > { %p3007_p13 = pneg %p3006_p12 }
  0x4b   : > { %p3012_p2 = pnand %p3010_p0, %p3007_p13 }
  0x4d   : > { %3015 = shalt.err (!%p3012_p2)
}
  0x4e   : > { %s3016_s26 = scalar_lea.vmem %s345_s15, 3072  ;;  %p3024_p4 = scmp.lt.s32.totalorder %s345_s15, %s345_s15 }
  0x4f   : > { %p3017_p5 = scmp.ne.s32.totalorder %s345_s15, %s3016_s26  ;;  %p3025_p10 = scmp.lt.s32.totalorder %s3016_s26, %s3016_s26 }
  0x51   : > { %p3019_p7 = pnand %p3017_p5, %p3335_p8  ;;  %p3026_p1 = por %p3025_p10, %p3024_p4 }
  0x53   : > { %p3020_p9 = pneg %p3019_p7 }
  0x55   : > { %p3027_p3 = pnand %p3026_p1, %p3020_p9 }
  0x57   : > { %3030 = shalt.err (!%p3027_p3)
}
  0x58   : > { %s3204_s30 = smov 192   ;;  %s3205_s11 = smov 12  }
  0x59   : > { %2715 = dma.hbm_to_vmem [thread:$0]  (!%p3319_p6), %s3841_s2, 3072, %s345_s15, [#allocation6], %s3204_s30, %s3204_s30, %s3205_s11  }
  0x5a   : > { %s3206_s18 = smov [#allocation10]   ;;  %s3031_s14 = scalar_lea.hbm %s3845_s6, 4096 }
  0x5b   : > { %s376_s19 = sshll.u32 %s3206_s18, 4  ;;  %p3032_p1 = scmp.ne.s32.totalorder %s3845_s6, %s3031_s14  ;;  %s377_s19 = int_to_ptr.vmem [resolvable:$true] %s376_s19 }
  0x5c   : > { %p3038_p12 = scmp.lt.u32.totalorder %s3031_s14, %s3845_s6 }
  0x5d   : > { %p3034_p3 = pnand %p3032_p1, %p3335_p8 }
  0x5f   : > { %p3035_p11 = pneg %p3034_p3 }
  0x61   : > { %p3040_p13 = pnand %p3038_p12, %p3035_p11 }
  0x63   : > { %3043 = shalt.err (!%p3040_p13)
}
  0x64   : > { %s3044_s15 = scalar_lea.vmem %s377_s19, 4096  ;;  %p3052_p7 = scmp.lt.s32.totalorder %s377_s19, %s377_s19 }
  0x65   : > { %p3045_p0 = scmp.ne.s32.totalorder %s377_s19, %s3044_s15  ;;  %p3053_p9 = scmp.lt.s32.totalorder %s3044_s15, %s3044_s15 }
  0x67   : > { %p3047_p2 = pnand %p3045_p0, %p3335_p8  ;;  %p3054_p4 = por %p3053_p9, %p3052_p7 }
  0x69   : > { %p3048_p5 = pneg %p3047_p2 }
  0x6b   : > { %p3055_p10 = pnand %p3054_p4, %p3048_p5 }
  0x6d   : > { %3058 = shalt.err (!%p3055_p10)
}
  0x6e   : > { %s3207_s30 = smov 256   ;;  %s3208_s11 = smov 16  }
  0x6f   : > { %2721 = dma.hbm_to_vmem [thread:$0]  (!%p3319_p6), %s3845_s6, 4096, %s377_s19, [#allocation9], %s3207_s30, %s3207_s30, %s3208_s11  }
  0x70   : > { %s3209_s12 = smov [#allocation11]   ;;  %s3059_s29 = scalar_lea.hbm %s3847_s8, 4096 }
  0x71   : > { %s392_s17 = sshll.u32 %s3209_s12, 4  ;;  %p3060_p1 = scmp.ne.s32.totalorder %s3847_s8, %s3059_s29  ;;  %s393_s17 = int_to_ptr.vmem [resolvable:$true] %s392_s17 }
  0x72   : > { %p3066_p12 = scmp.lt.u32.totalorder %s3059_s29, %s3847_s8 }
  0x73   : > { %p3062_p3 = pnand %p3060_p1, %p3335_p8 }
  0x75   : > { %p3063_p11 = pneg %p3062_p3 }
  0x77   : > { %p3068_p13 = pnand %p3066_p12, %p3063_p11 }
  0x79   : > { %3071 = shalt.err (!%p3068_p13)
}
  0x7a   : > { %s3072_s19 = scalar_lea.vmem %s393_s17, 4096  ;;  %p3080_p7 = scmp.lt.s32.totalorder %s393_s17, %s393_s17 }
  0x7b   : > { %p3073_p0 = scmp.ne.s32.totalorder %s393_s17, %s3072_s19  ;;  %p3081_p9 = scmp.lt.s32.totalorder %s3072_s19, %s3072_s19 }
  0x7d   : > { %p3075_p2 = pnand %p3073_p0, %p3335_p8  ;;  %p3082_p4 = por %p3081_p9, %p3080_p7 }
  0x7f   : > { %p3076_p5 = pneg %p3075_p2 }
  0x81   : > { %p3083_p10 = pnand %p3082_p4, %p3076_p5 }
  0x83   : > { %3086 = shalt.err (!%p3083_p10)
}
  0x84   : > { %s3866_s30 = smov 4   ;;  %s3867_s11 = smov 64  }
  0x85   : > { %2724 = dma.hbm_to_vmem [thread:$0]  (!%p3319_p6), %s3847_s8, 4096, %s393_s17, [#allocation12], %s3867_s11, %s3867_s11, %s3866_s30  }
  0x86   : > { %s2408_s13 = sadd.s32 4294967294, %s3195_s24   ;;  %s3442_s25 = sadd.s32 1, %s3195_s24  }
  0x87   : > { %s38_s12 = sadd.s32 1, %s3191_s23  ;;  %s35_s18 = ssub.s32 %s3195_s24, %s3442_s25 }
  0x88   : > { %p45_p8 = scmp.ne.s32.totalorder %s3191_s23, %s3187_s22  ;;  %p36_p1 = scmp.eq.s32.totalorder %s35_s18, 0 }
  0x89   : > { %p46_p3 = scmp.eq.s32.totalorder %s3195_s24, 0  ;;  %p51_p11 = scmp.ne.s32.totalorder %s3187_s22, %s3183_s21 }
  0x8a   : > { %p306_p12 = scmp.eq.s32.totalorder %s3303_s27, 1  ;;  %p3868_p0 = scmp.eq.s32.totalorder %s3303_s27, 0 }
  0x8b   : > { %s3454_s20 = scalar_select %p36_p1, %s3191_s23, %s38_s12  }
  0x8c   : > { %p47_p13 = por %p46_p3, %p45_p8  ;;  %p3458_p2 = por %p3868_p0, %p51_p11 }
  0x8d   : > { %p3462_p6 = por %p306_p12, %p45_p8  ;;  %p312_p5 = scmp.eq.s32.totalorder %s2408_s13, 1 }
  0x8e   : > { %p2738_p7 = scmp.lt.s32.totalorder %s3195_s24, 2  ;;  %s415_s14 = sand.u32 1, %s3191_s23  }
  0x8f   : > { %s3870_s17 = scalar_select %p3462_p6, 1, 0 }
  0x90   : > { %p3468_p9 = por %p312_p5, %p51_p11  ;;  %s2416_s26 = sshll.u32 %s415_s14, 1 }
  0x91   : > { %s2417_s15 = sshll.u32 %s3195_s24, 5  ;;  %s3872_s0 = sld [smem:[#allocation19_spill]] }
  0x92   : > { %s3871_s16 = scalar_select %p3468_p9, 1, 0 }
  0x93   : > { %s419_s10 = scalar_lea.vmem [#allocation2], %s2416_s26  ;;  %p3478_p4 = pnand %p2738_p7, %p47_p13 }
  0x94   : > { %s426_s9 = sshll.u32 %s419_s10, 4  ;;  %s416_s12 = scalar_lea.sflag [#allocation3], %s415_s14  ;;  %s3482_s9 = int_to_ptr.vmem [resolvable:$true] %s426_s9 }
  0x95   : > { %p3089_p8 = pneg %p3478_p4 }
  0x97   : > { %s3476_s11 = scalar_lea.hbm %s3872_s0, %s2417_s15  ;;  %s3092_s19 = scalar_lea.hbm %s3872_s0, 64 }
  0x98   : > { %s3087_s18 = scalar_lea.hbm %s3476_s11, 32  ;;  %p3093_p11 = scmp.lt.u32.totalorder %s3476_s11, %s3872_s0 }
  0x99   : > { %p3088_p10 = scmp.ne.s32.totalorder %s3476_s11, %s3087_s18  ;;  %p3094_p12 = scmp.lt.u32.totalorder %s3092_s19, %s3087_s18 }
  0x9a   : > { %p3096_p0 = scmp.lt.u32.totalorder %s3087_s18, %s3476_s11 }
  0x9b   : > { %p3090_p1 = pnand %p3089_p8, %p3088_p10  ;;  %p3095_p13 = por %p3094_p12, %p3093_p11 }
  0x9d   : > { %p3091_p3 = pneg %p3090_p1  ;;  %p3097_p5 = por %p3096_p0, %p3095_p13 }
  0x9f   : > { %p3098_p7 = pnand %p3097_p5, %p3091_p3 }
  0xa1   : > { %3101 = shalt.err (!%p3098_p7)
}
  0xa2   : > { %s3102_s14 = scalar_lea.vmem %s3482_s9, 32  ;;  %s3210_s15 = smov [#allocation2]  }
  0xa3   : > { %p3103_p10 = scmp.ne.s32.totalorder %s3482_s9, %s3102_s14  ;;  %s3107_s26 = sshll.u32 %s3210_s15, 4  ;;  %s3108_s26 = int_to_ptr.vmem [resolvable:$false] %s3107_s26 }
  0xa4   : > { %s3109_s30 = scalar_lea.vmem %s3108_s26, 64  ;;  %p3110_p6 = scmp.lt.s32.totalorder %s3482_s9, %s3108_s26 }
  0xa5   : > { %p3105_p1 = pnand %p3103_p10, %p3089_p8  ;;  %p3111_p11 = scmp.lt.s32.totalorder %s3109_s30, %s3102_s14 }
  0xa7   : > { %p3106_p9 = pneg %p3105_p1  ;;  %p3112_p12 = por %p3111_p11, %p3110_p6 }
  0xa9   : > { %p3113_p13 = pnand %p3112_p12, %p3106_p9 }
  0xab   : > { %3116 = shalt.err (!%p3113_p13)
}
  0xac   : > { %2728 = dma.hbm_to_vmem [thread:$0]  (!%p3478_p4), %s3476_s11, 32, %s3482_s9, %s416_s12  }
  0xad   : > { %p3874_p3 = scmp.ne.s32.totalorder %s3863_s28, 0 }
  0xae   : > { %s3512_s18 = sand.u32 (!%p3874_p3), 1, %s3187_s22  }
  0xaf   : > { %435 = sbr.rel (%p3874_p3) target bundleno = 2681 (0xa79), region = 68  ;;  %s2419_s19 = sshll.u32 (!%p3874_p3), %s3512_s18, 1 }
  0xb0   : > { %s438_s10 = scalar_lea.sflag (!%p3874_p3), [#allocation3], %s3512_s18  ;;  %s441_s14 = scalar_lea.vmem (!%p3874_p3), [#allocation2], %s2419_s19 }
  0xb6   : > { %3162 = dma.done.wait (%p3458_p2), %s438_s10, 32  }
  0xb7   : > { %3164 = vsyncadd (%p3458_p2), %s438_s10, 4294967264  ;;  %p3875_p6 = scmp.eq.s32.totalorder %s3303_s27, 0 }
  0xb9   : > { %3166 = dma.done.wait (%p3875_p6), [#allocation6], 3328   ;;  %p3876_p9 = pmov %p3875_p6 }
  0xba   : > { %p3877_p4 = pmov %p3875_p6 }
  0xbb   : > { %3168 = vsyncadd (%p3876_p9), [#allocation6], 4294963968 }
  0xbc   : > { %3170 = dma.done.wait (%p3877_p4), [#allocation9], 5120   ;;  %p3878_p8 = pmov %p3877_p4 }
  0xbd   : > { %p3879_p0 = pmov %p3877_p4 }
  0xbe   : > { %3172 = vsyncadd (%p3878_p8), [#allocation9], 4294962176 }
  0xbf   : > { %3174 = dma.done.wait (%p3879_p0), [#allocation12], 4096   ;;  %p3880_p5 = pmov %p3879_p0 }
  0xc0   : > { %v510_v0 = vlaneseq  ;;  %v3211_v1 = vmov 0.0   ;;  %v3538_v4 = vld [vmem:[%s441_s14] sm:$0x3]  ;;  %v2795_v25 = vld [vmem:[#allocation7 + $0x4] ss:$12 sps:$4 sm:$0xff]   ;;  %s3881_s30 = sld [smem:[#allocation20_spill]] }
  0xc1   : > { %3176 = vsyncadd (%p3880_p5), [#allocation12], 4294963200  ;;  %2621 = vmatprep.subr.bf16.mxu1 %v3211_v1  ;;  %vm532_vm0 = vcmp.eq.s32.totalorder %v3538_v4, 1  ;;  %vm507_vm1 = vcmp.eq.s32.totalorder %v3538_v4, 0  ;;  %vm557_vm2 = vcmp.eq.s32.totalorder %v3538_v4, 2  ;;  %vm582_vm3 = vcmp.eq.s32.totalorder %v3538_v4, 3  ;;  %1068 = vmatprep.subr.bf16.mxu0 %v2795_v25 }
  0xc2   : > { %v3533_v2 = vshrl.u32 %v510_v0, 7  ;;  %v2427_v6 = vsel %vm532_vm0, 1.0, %v3211_v1  ;;  %v2426_v7 = vsel %vm507_vm1, 1.0, %v3211_v1  ;;  %v2428_v12 = vsel %vm557_vm2, 1.0, %v3211_v1  ;;  %v2797_v28 = vld [vmem:[#allocation7] ss:$12 sps:$4 sm:$0xff]  }
  0xc3   : > { %v2429_v15 = vsel %vm582_vm3, 1.0, %v3211_v1  ;;  %vm607_vm4 = vcmp.eq.s32.totalorder %v3538_v4, 4  ;;  %vm632_vm5 = vcmp.eq.s32.totalorder %v3538_v4, 5  ;;  %vm657_vm6 = vcmp.eq.s32.totalorder %v3538_v4, 6  ;;  %v2798_v29 = vld [vmem:[#allocation7 + $0x8] ss:$12 sps:$4 sm:$0xff]   ;;  %1069 = vmatpush1.bf16.msra.mxu0 %v2797_v28 }
  0xc4   : > { %v3536_v3 = vsub.s32 0, %v3533_v2  ;;  %v3543_v5 = vsub.s32 1, %v3533_v2  ;;  %v2430_v18 = vsel %vm607_vm4, 1.0, %v3211_v1  ;;  %v2431_v21 = vsel %vm632_vm5, 1.0, %v3211_v1  ;;  %2622 = vmatpush3.bf16.msra.mxu1 %v2798_v29  ;;  %v2799_v31 = vld [vmem:[#allocation7 + $0x1c] ss:$12 sps:$4 sm:$0xff]  }
  0xc5   : > { %vm682_vm7 = vcmp.eq.s32.totalorder %v3538_v4, 7  ;;  %v2432_v24 = vsel %vm657_vm6, 1.0, %v3211_v1  ;;  %vm707_vm8 = vcmp.eq.s32.totalorder %v3538_v4, 8  ;;  %2623 = vmatprep.subr.bf16.mxu1 %v3211_v1  ;;  %v2801_v34 = vld [vmem:[#allocation7 + $0x18] ss:$12 sps:$4 sm:$0xff]   ;;  %1070 = vmatprep.subr.bf16.mxu0 %v2799_v31  ;;  %vm732_vm9 = vcmp.eq.s32.totalorder %v3538_v4, 9 }
  0xc6   : > { %v538_v8 = vrot.slane %v2427_v6, %v3536_v3  ;;  %v513_v9 = vrot.slane %v2426_v7, %v3536_v3  ;;  %v545_v10 = vrot.slane %v2427_v6, %v3543_v5  ;;  %v520_v11 = vrot.slane %v2426_v7, %v3543_v5  ;;  %v2802_v35 = vld [vmem:[#allocation7 + $0x20] ss:$12 sps:$4 sm:$0xff]   ;;  %v2805_v40 = vld [vmem:[#allocation7 + $0x30] ss:$12 sps:$4 sm:$0xff]   ;;  %v2806_v41 = vld [vmem:[#allocation7 + $0x38] ss:$12 sps:$4 sm:$0xff]  }
  0xc7   : > { %v570_v13 = vrot.slane %v2428_v12, %v3543_v5  ;;  %v563_v14 = vrot.slane %v2428_v12, %v3536_v3  ;;  %v595_v16 = vrot.slane %v2429_v15, %v3543_v5  ;;  %v588_v17 = vrot.slane %v2429_v15, %v3536_v3  ;;  %1071 = vmatpush1.bf16.msra.mxu0 %v2801_v34  ;;  %v2803_v37 = vld [vmem:[#allocation7 + $0x34] ss:$12 sps:$4 sm:$0xff]   ;;  %v2807_v46 = vld [vmem:[#allocation7 + $0x4c] ss:$12 sps:$4 sm:$0xff]   ;;  %v2810_v50 = vld [vmem:[#allocation7 + $0x50] ss:$12 sps:$4 sm:$0xff]  }
  0xc8   : > { %540 = vbcast.lane.b32.xlu1 %v538_v8, 256  ;;  %515 = vbcast.lane.b32.xlu0 %v513_v9, 256  ;;  %v620_v19 = vrot.slane %v2430_v18, %v3543_v5  ;;  %v613_v20 = vrot.slane %v2430_v18, %v3536_v3  ;;  %v645_v22 = vrot.slane %v2431_v21, %v3543_v5  ;;  %v2433_v30 = vsel %vm682_vm7, 1.0, %v3211_v1  ;;  %v2809_v49 = vld [vmem:[#allocation7 + $0x48] ss:$12 sps:$4 sm:$0xff]   ;;  %s2425_s19 = sshll.u32 %s3512_s18, 4 }
  0xc9   : > { %v638_v23 = vrot.slane %v2431_v21, %v3536_v3  ;;  %v670_v26 = vrot.slane %v2432_v24, %v3543_v5  ;;  %v663_v27 = vrot.slane %v2432_v24, %v3536_v3  ;;  %v695_v32 = vrot.slane %v2433_v30, %v3543_v5  ;;  %2624 = vmatpush3.bf16.msra.mxu1 %v2802_v35  ;;  %v2811_v54 = vld [vmem:[#allocation7 + $0x64] ss:$12 sps:$4 sm:$0xff]   ;;  %v2813_v57 = vld [vmem:[#allocation7 + $0x60] ss:$12 sps:$4 sm:$0xff]   ;;  %v2814_v58 = vld [vmem:[#allocation7 + $0x68] ss:$12 sps:$4 sm:$0xff]  }
  0xca   : > { %v688_v33 = vrot.slane %v2433_v30, %v3536_v3  ;;  %v2434_v36 = vsel %vm707_vm8, 1.0, %v3211_v1  ;;  %vm757_vm10 = vcmp.eq.s32.totalorder %v3538_v4, 10  ;;  %vm782_vm11 = vcmp.eq.s32.totalorder %v3538_v4, 11  ;;  %2625 = vmatprep.subr.bf16.mxu1 %v3211_v1  ;;  %1072 = vmatprep.subr.bf16.mxu0 %v2803_v37  ;;  %v2815_v59 = vld [vmem:[#allocation7 + $0x7c] ss:$12 sps:$4 sm:$0xff]   ;;  %v505_v31 = vld [vmem:[#allocation5] sm:$0xff] }
  0xcb   : > { %vm807_vm12 = vcmp.eq.s32.totalorder %v3538_v4, 12  ;;  %v720_v38 = vrot.slane %v2434_v36, %v3543_v5  ;;  %v713_v39 = vrot.slane %v2434_v36, %v3536_v3  ;;  %v2435_v42 = vsel %vm732_vm9, 1.0, %v3211_v1  ;;  %1073 = vmatpush1.bf16.msra.mxu0 %v2805_v40  ;;  %v2817_v62 = vld [vmem:[#allocation7 + $0x78] ss:$12 sps:$4 sm:$0xff]   ;;  %v2818_v63 = vld [vmem:[#allocation7 + $0x80] ss:$12 sps:$4 sm:$0xff]  }
  0xcc   : > { %547 = vbcast.lane.b32.xlu1 %v545_v10, 256  ;;  %522 = vbcast.lane.b32.xlu0 %v520_v11, 256  ;;  %v2436_v43 = vsel %vm757_vm10, 1.0, %v3211_v1  ;;  %vm832_vm13 = vcmp.eq.s32.totalorder %v3538_v4, 13  ;;  %vm857_vm14 = vcmp.eq.s32.totalorder %v3538_v4, 14  ;;  %vm882_vm15 = vcmp.eq.s32.totalorder %v3538_v4, 15 }
  0xcd   : > { %2626 = vmatpush3.bf16.msra.mxu1 %v2806_v41  ;;  %v2437_v44 = vsel %vm782_vm11, 1.0, %v3211_v1  ;;  %v2438_v45 = vsel %vm807_vm12, 1.0, %v3211_v1  ;;  %v745_v47 = vrot.slane %v2435_v42, %v3543_v5  ;;  %v738_v48 = vrot.slane %v2435_v42, %v3536_v3  ;;  %1074 = vmatprep.subr.bf16.mxu0 %v2807_v46  ;;  %v2819_v0 = vld [vmem:[#allocation7 + $0x94] ss:$12 sps:$4 sm:$0xff]   ;;  %v2821_v7 = vld [vmem:[#allocation7 + $0x90] ss:$12 sps:$4 sm:$0xff]  }
  0xce   : > { %2627 = vmatprep.subr.bf16.mxu1 %v3211_v1  ;;  %v2439_v51 = vsel %vm832_vm13, 1.0, %v3211_v1  ;;  %v2440_v52 = vsel %vm857_vm14, 1.0, %v3211_v1  ;;  %v3602_v53 = vsel %vm882_vm15, 1.0, %v3211_v1  ;;  %v770_v55 = vrot.slane %v2436_v43, %v3543_v5  ;;  %v2822_v8 = vld [vmem:[#allocation7 + $0x98] ss:$12 sps:$4 sm:$0xff]   ;;  %s3882_s28 = sld [smem:[#allocation21_spill]] }
  0xcf   : > { %1075 = vmatpush1.bf16.msra.mxu0 %v2809_v49  ;;  %v763_v56 = vrot.slane %v2436_v43, %v3536_v3  ;;  %v795_v60 = vrot.slane %v2437_v44, %v3543_v5  ;;  %v788_v61 = vrot.slane %v2437_v44, %v3536_v3  ;;  %v820_v4 = vrot.slane %v2438_v45, %v3543_v5  ;;  %v2823_v9 = vld [vmem:[#allocation7 + $0xac] ss:$12 sps:$4 sm:$0xff]   ;;  %v2825_v12 = vld [vmem:[#allocation7 + $0xa8] ss:$12 sps:$4 sm:$0xff]   ;;  %s3883_s9 = sld [smem:[#allocation22_spill]]  ;;  %s2550_s13 = sshll.u32 %s3303_s27, 8 }
  0xd0   : > { %572 = vbcast.lane.b32.xlu1 %v570_v13, 256  ;;  %565 = vbcast.lane.b32.xlu0 %v563_v14, 256  ;;  %v813_v6 = vrot.slane %v2438_v45, %v3536_v3  ;;  %v845_v10 = vrot.slane %v2439_v51, %v3543_v5  ;;  %v838_v11 = vrot.slane %v2439_v51, %v3536_v3  ;;  %v2826_v13 = vld [vmem:[#allocation7 + $0xb0] ss:$12 sps:$4 sm:$0xff]   ;;  %v3212_v14 = vmov 0   ;;  %s501_s12 = scalar_lea.vmem [#allocation13], %s2425_s19 }
  0xd1   : > { %2628 = vmatpush3.bf16.msra.mxu1 %v2810_v50  ;;  %1076 = vmatprep.subr.bf16.mxu0 %v2811_v54  ;;  %vm3213_vm0 = vmmov 0   ;;  %v870_v15 = vrot.slane %v2440_v52, %v3543_v5  ;;  %v888_v18 = vrot.slane %v3602_v53, %v3536_v3  ;;  %v3628_v34 = vsub.s32 2, %v3533_v2  ;;  %s2287_s15 = sshll.u32 %s501_s12, 4  ;;  %s3884_s0 = sld [smem:[#allocation23_spill]]  ;;  %s3795_s15 = int_to_ptr.vmem [resolvable:$true] %s2287_s15 }
  0xd2   : > { %2629 = vmatprep.subr.bf16.mxu1 %v3211_v1  ;;  %1100 = vmatprep.mubr.bf16.mxu0 %v3212_v14  ;;  %v3631_v35 = vsub.s32 3, %v3533_v2  ;;  %v552_v36 = vrot.slane %v505_v31, %v3543_v5  ;;  %v527_v37 = vrot.slane %v505_v31, %v3536_v3  ;;  %v626_v41 = vsub.s32 4, %v3533_v2  ;;  %s2274_s14 = scalar_lea.sflag [#allocation4], %s3512_s18  ;;  %p3885_p7 = scmp.ne.s32.totalorder %s3870_s17, 0 }
  0xd3   : > { %1077 = vmatpush1.bf16.msra.mxu0 %v2813_v57  ;;  %2637 = vmatprep.mubr.msk.bf16.mxu1 %vm3213_vm0, %v3211_v1  ;;  %v577_v40 = vrot.slane %v505_v31, %v3628_v34  ;;  %v651_v43 = vsub.s32 5, %v3533_v2  ;;  %vm1268_vm1 = vcmask 1043456   ;;  %vm1238_vm2 = vcmask 64512   ;;  %s3214_s27 = smov [#allocation13]  }
  0xd4   : > { %597 = vbcast.lane.b32.xlu1 %v595_v16, 256  ;;  %590 = vbcast.lane.b32.xlu0 %v588_v17, 256  ;;  %v863_v16 = vrot.slane %v2440_v52, %v3536_v3  ;;  %v895_v17 = vrot.slane %v3602_v53, %v3543_v5  ;;  %v602_v42 = vrot.slane %v505_v31, %v3631_v35  ;;  %s3121_s19 = sshll.u32 %s3214_s27, 4  ;;  %s3122_s19 = int_to_ptr.vmem [resolvable:$false] %s3121_s19 }
  0xd5   : > { %2630 = vmatpush3.bf16.msra.mxu1 %v2814_v58  ;;  %1078 = vmatprep.subr.bf16.mxu0 %v2815_v59  ;;  %v627_v53 = vrot.slane %v505_v31, %v626_v41  ;;  %v652_v54 = vrot.slane %v505_v31, %v651_v43  ;;  %s3123_s29 = scalar_lea.vmem %s3122_s19, 512  ;;  %p3124_p11 = scmp.lt.s32.totalorder %s3795_s15, %s3122_s19 }
  0xd6   : > { %2631 = vmatprep.subr.bf16.mxu1 %v3211_v1 }
  0xd7   : > { %1079 = vmatpush1.bf16.msra.mxu0 %v2817_v62  ;;  %s3793_s10 = scalar_lea.hbm %s3884_s0, %s2550_s13 }
  0xd8   : > { %622 = vbcast.lane.b32.xlu1 %v620_v19, 256  ;;  %615 = vbcast.lane.b32.xlu0 %v613_v20, 256 }
  0xd9   : > { %2632 = vmatpush3.bf16.msra.mxu1 %v2818_v63  ;;  %1080 = vmatprep.subr.bf16.mxu0 %v2819_v0 }
  0xda   : > { %2633 = vmatprep.subr.bf16.mxu1 %v3211_v1 }
  0xdb   : > { %1081 = vmatpush1.bf16.msra.mxu0 %v2821_v7  ;;  %v506_v7 = vld [vmem:[#allocation5 + $0x8] sm:$0xff] }
  0xdc   : > { %647 = vbcast.lane.b32.xlu1 %v645_v22, 256  ;;  %640 = vbcast.lane.b32.xlu0 %v638_v23, 256 }
  0xdd   : > { %2634 = vmatpush3.bf16.msra.mxu1 %v2822_v8  ;;  %1082 = vmatprep.subr.bf16.mxu0 %v2823_v9 }
  0xde   : > { %2635 = vmatprep.subr.bf16.mxu1 %v3211_v1 }
  0xdf   : > { %1083 = vmatpush1.bf16.msra.mxu0 %v2825_v12 }
  0xe0   : > { %672 = vbcast.lane.b32.xlu1 %v670_v26, 256  ;;  %665 = vbcast.lane.b32.xlu0 %v663_v27, 256 }
  0xe1   : > { %2636 = vmatpush3.bf16.msra.mxu1 %v2826_v13  ;;  %2665 = vmatprep.subr.bf16.mxu0 %v3211_v1  ;;  %v727_v13 = vrot.slane %v506_v7, %v3536_v3 }
  0xe2   : > { %2641 = vmatprep.subr.bf16.mxu1 %v3211_v1 }
  0xe4   : > { %697 = vbcast.lane.b32.xlu1 %v695_v32, 256  ;;  %690 = vbcast.lane.b32.xlu0 %v688_v33, 256 }
  0xe8   : > { %722 = vbcast.lane.b32.xlu1 %v720_v38, 256  ;;  %715 = vbcast.lane.b32.xlu0 %v713_v39, 256 }
  0xec   : > { %747 = vbcast.lane.b32.xlu1 %v745_v47, 256  ;;  %740 = vbcast.lane.b32.xlu0 %v738_v48, 256  ;;  %v676_v48 = vsub.s32 6, %v3533_v2 }
  0xf0   : > { %772 = vbcast.lane.b32.xlu1 %v770_v55, 256  ;;  %765 = vbcast.lane.b32.xlu0 %v763_v56, 256  ;;  %v701_v55 = vsub.s32 7, %v3533_v2 }
  0xf2   : > { %v702_v8 = vrot.slane %v505_v31, %v701_v55 }
  0xf4   : > { %797 = vbcast.lane.b32.xlu1 %v795_v60, 256  ;;  %790 = vbcast.lane.b32.xlu0 %v788_v61, 256  ;;  %v677_v60 = vrot.slane %v505_v31, %v676_v48 }
  0xf8   : > { %822 = vbcast.lane.b32.xlu1 %v820_v4, 256  ;;  %815 = vbcast.lane.b32.xlu0 %v813_v6, 256 }
  0xfc   : > { %847 = vbcast.lane.b32.xlu1 %v845_v10, 256  ;;  %840 = vbcast.lane.b32.xlu0 %v838_v11, 256 }
 0x100   : > { %872 = vbcast.lane.b32.xlu1 %v870_v15, 256  ;;  %865 = vbcast.lane.b32.xlu0 %v863_v16, 256 }
 0x104   : > { %897 = vbcast.lane.b32.xlu1 %v895_v17, 256  ;;  %890 = vbcast.lane.b32.xlu0 %v888_v18, 256 }
 0x13a   : > { %v541_v19 = vpop.permute.xlu1 %540  ;;  %v516_v20 = vpop.permute.xlu0 %515 }
 0x13b   : > { %v553_v44 = vmul.f32 %v552_v36, %v541_v19  ;;  %v528_v45 = vmul.f32 %v527_v37, %v516_v20 }
 0x13d   : > { %v555_v56 = vadd.f32 %v553_v44, %v528_v45  ;;  %v827_v44 = vrot.slane %v506_v7, %v626_v41 }
 0x13e   : > { %v548_v21 = vpop.permute.xlu1 %547  ;;  %v523_v22 = vpop.permute.xlu0 %522 }
 0x13f   : > { %v554_v46 = vmul.f32 %v552_v36, %v548_v21  ;;  %v529_v47 = vmul.f32 %v527_v37, %v523_v22  ;;  %v752_v21 = vrot.slane %v506_v7, %v3543_v5  ;;  %v802_v37 = vrot.slane %v506_v7, %v3631_v35 }
 0x141   : > { %v556_v57 = vadd.f32 %v554_v46, %v529_v47 }
 0x142   : > { %v573_v23 = vpop.permute.xlu1 %572  ;;  %v566_v24 = vpop.permute.xlu0 %565 }
 0x143   : > { %v579_v51 = vmul.f32 %v577_v40, %v573_v23  ;;  %v578_v52 = vmul.f32 %v577_v40, %v566_v24 }
 0x145   : > { %v581_v63 = vadd.f32 %v579_v51, %v556_v57  ;;  %v580_v0 = vadd.f32 %v578_v52, %v555_v56  ;;  %v852_v52 = vrot.slane %v506_v7, %v651_v43  ;;  %v902_v43 = vrot.slane %v506_v7, %v701_v55 }
 0x146   : > { %v598_v25 = vpop.permute.xlu1 %597  ;;  %v591_v26 = vpop.permute.xlu0 %590 }
 0x147   : > { %v604_v58 = vmul.f32 %v602_v42, %v598_v25  ;;  %v603_v59 = vmul.f32 %v602_v42, %v591_v26  ;;  %v777_v26 = vrot.slane %v506_v7, %v3628_v34 }
 0x149   : > { %v606_v9 = vadd.f32 %v604_v58, %v581_v63  ;;  %v605_v10 = vadd.f32 %v603_v59, %v580_v0  ;;  %v877_v58 = vrot.slane %v506_v7, %v676_v48 }
 0x14a   : > { %v623_v27 = vpop.permute.xlu1 %622  ;;  %v616_v28 = vpop.permute.xlu0 %615 }
 0x14b   : > { %v629_v4 = vmul.f32 %v627_v53, %v623_v27  ;;  %v628_v6 = vmul.f32 %v627_v53, %v616_v28 }
 0x14d   : > { %v631_v17 = vadd.f32 %v629_v4, %v606_v9  ;;  %v630_v18 = vadd.f32 %v628_v6, %v605_v10 }
 0x14e   : > { %v648_v29 = vpop.permute.xlu1 %647  ;;  %v641_v30 = vpop.permute.xlu0 %640 }
 0x14f   : > { %v654_v11 = vmul.f32 %v652_v54, %v648_v29  ;;  %v653_v12 = vmul.f32 %v652_v54, %v641_v30 }
 0x151   : > { %v656_v22 = vadd.f32 %v654_v11, %v631_v17  ;;  %v655_v23 = vadd.f32 %v653_v12, %v630_v18 }
 0x152   : > { %v673_v32 = vpop.permute.xlu1 %672  ;;  %v666_v33 = vpop.permute.xlu0 %665 }
 0x153   : > { %v679_v19 = vmul.f32 %v677_v60, %v673_v32  ;;  %v678_v20 = vmul.f32 %v677_v60, %v666_v33 }
 0x155   : > { %v681_v29 = vadd.f32 %v679_v19, %v656_v22  ;;  %v680_v30 = vadd.f32 %v678_v20, %v655_v23 }
 0x156   : > { %v698_v38 = vpop.permute.xlu1 %697  ;;  %v691_v39 = vpop.permute.xlu0 %690 }
 0x157   : > { %v704_v24 = vmul.f32 %v702_v8, %v698_v38  ;;  %v703_v25 = vmul.f32 %v702_v8, %v691_v39 }
 0x159   : > { %v706_v40 = vadd.f32 %v704_v24, %v681_v29  ;;  %v705_v42 = vadd.f32 %v703_v25, %v680_v30 }
 0x15a   : > { %v723_v49 = vpop.permute.xlu1 %722  ;;  %v716_v50 = vpop.permute.xlu0 %715 }
 0x15b   : > { %v729_v31 = vmul.f32 %v727_v13, %v723_v49  ;;  %v728_v36 = vmul.f32 %v727_v13, %v716_v50 }
 0x15d   : > { %v731_v47 = vadd.f32 %v729_v31, %v706_v40  ;;  %v730_v38 = vadd.f32 %v728_v36, %v705_v42 }
 0x15e   : > { %v748_v61 = vpop.permute.xlu1 %747  ;;  %v741_v62 = vpop.permute.xlu0 %740 }
 0x15f   : > { %v754_v32 = vmul.f32 %v752_v21, %v748_v61  ;;  %v753_v33 = vmul.f32 %v752_v21, %v741_v62 }
 0x161   : > { %v756_v53 = vadd.f32 %v754_v32, %v731_v47  ;;  %v755_v54 = vadd.f32 %v753_v33, %v730_v38 }
 0x162   : > { %v773_v15 = vpop.permute.xlu1 %772  ;;  %v766_v16 = vpop.permute.xlu0 %765 }
 0x163   : > { %v779_v39 = vmul.f32 %v777_v26, %v773_v15  ;;  %v778_v51 = vmul.f32 %v777_v26, %v766_v16 }
 0x165   : > { %v781_v59 = vadd.f32 %v779_v39, %v756_v53  ;;  %v780_v60 = vadd.f32 %v778_v51, %v755_v54 }
 0x166   : > { %v798_v27 = vpop.permute.xlu1 %797  ;;  %v791_v28 = vpop.permute.xlu0 %790 }
 0x167   : > { %v804_v56 = vmul.f32 %v802_v37, %v798_v27  ;;  %v803_v57 = vmul.f32 %v802_v37, %v791_v28 }
 0x169   : > { %v806_v62 = vadd.f32 %v804_v56, %v781_v59  ;;  %v805_v63 = vadd.f32 %v803_v57, %v780_v60 }
 0x16a   : > { %v823_v45 = vpop.permute.xlu1 %822  ;;  %v816_v46 = vpop.permute.xlu0 %815 }
 0x16b   : > { %v829_v61 = vmul.f32 %v827_v44, %v823_v45  ;;  %v828_v41 = vmul.f32 %v827_v44, %v816_v46 }
 0x16d   : > { %v831_v9 = vadd.f32 %v829_v61, %v806_v62  ;;  %v830_v10 = vadd.f32 %v828_v41, %v805_v63 }
 0x16e   : > { %v848_v49 = vpop.permute.xlu1 %847  ;;  %v841_v50 = vpop.permute.xlu0 %840 }
 0x16f   : > { %v854_v0 = vmul.f32 %v852_v52, %v848_v49  ;;  %v853_v4 = vmul.f32 %v852_v52, %v841_v50 }
 0x171   : > { %v856_v13 = vadd.f32 %v854_v0, %v831_v9  ;;  %v855_v15 = vadd.f32 %v853_v4, %v830_v10  ;;  %v2827_v0 = vld [vmem:[#allocation8] sm:$0xff]   ;;  %v2828_v4 = vld [vmem:[#allocation8 + $0x8] sm:$0xff]  }
 0x172   : > { %v873_v6 = vpop.permute.xlu1 %872  ;;  %v866_v8 = vpop.permute.xlu0 %865 }
 0x173   : > { %v879_v11 = vmul.f32 %v877_v58, %v873_v6  ;;  %v878_v12 = vmul.f32 %v877_v58, %v866_v8  ;;  %v2829_v6 = vld [vmem:[#allocation8 + $0x10] sm:$0xff]   ;;  %v2830_v8 = vld [vmem:[#allocation8 + $0x18] sm:$0xff]  }
 0x175   : > { %v881_v17 = vadd.f32 %v879_v11, %v856_v13  ;;  %v880_v18 = vadd.f32 %v878_v12, %v855_v15 }
 0x176   : > { %v898_v48 = vpop.permute.xlu1 %897  ;;  %v891_v16 = vpop.permute.xlu0 %890 }
 0x177   : > { %v904_v19 = vmul.f32 %v902_v43, %v898_v48  ;;  %v903_v20 = vmul.f32 %v902_v43, %v891_v16  ;;  %v2831_v43 = vld [vmem:[#allocation8 + $0x20] sm:$0xff]  }
 0x179   : > { %v3653_v21 = vadd.f32 %v904_v19, %v881_v17  ;;  %v3655_v22 = vadd.f32 %v903_v20, %v880_v18  ;;  %v2832_v17 = vld [vmem:[#allocation8 + $0x28] sm:$0xff]   ;;  %v2833_v18 = vld [vmem:[#allocation8 + $0x30] sm:$0xff]   ;;  %v2834_v19 = vld [vmem:[#allocation8 + $0x38] sm:$0xff]  }
 0x17b   : > { %v907_v2 = vpack.c.bf16 %v3653_v21, %v3655_v22 }
 0x17d   : > { %1101 = vmatmul.mubr.bf16.vlgmr.msra.gmra.mrb[0].mxu0 %v907_v2  ;;  %2638 = vmatmul.mubr.bf16.vlgmr.msra.gmra.mrb[0].mxu1 %v907_v2 }
 0x17e   : > { %2643 = vmatprep.mubr.msk.bf16.mxu1 %vm3213_vm0, %v3211_v1  ;;  %2681 = vmatprep.mubr.msk.bf16.mxu0 %vm3213_vm0, %v3211_v1 }
 0x17f   : > { %2666 = vmatpush3.bf16.msra.mxu0 %v2827_v0  ;;  %v2870_v0 = vld [vmem:[#allocation10 + $0xac] ss:$16 sps:$4 sm:$0xff]  }
 0x180   : > { %2667 = vmatprep.subr.bf16.mxu0 %v3211_v1 }
 0x183   : > { %2668 = vmatpush3.bf16.msra.mxu0 %v2828_v4  ;;  %v2865_v4 = vld [vmem:[#allocation10 + $0xa0] ss:$16 sps:$4 sm:$0xff]  }
 0x184   : > { %2669 = vmatprep.subr.bf16.mxu0 %v3211_v1 }
 0x187   : > { %2670 = vmatpush3.bf16.msra.mxu0 %v2829_v6  ;;  %v2868_v6 = vld [vmem:[#allocation10 + $0xa8] ss:$16 sps:$4 sm:$0xff]  }
 0x188   : > { %2671 = vmatprep.subr.bf16.mxu0 %v3211_v1 }
 0x18b   : > { %2672 = vmatpush3.bf16.msra.mxu0 %v2830_v8  ;;  %v2873_v8 = vld [vmem:[#allocation10 + $0xc4] ss:$16 sps:$4 sm:$0xff]  }
 0x18c   : > { %2673 = vmatprep.subr.bf16.mxu0 %v3211_v1 }
 0x18f   : > { %2674 = vmatpush3.bf16.msra.mxu0 %v2831_v43  ;;  %v2876_v43 = vld [vmem:[#allocation10 + $0xcc] ss:$16 sps:$4 sm:$0xff]  }
 0x190   : > { %2675 = vmatprep.subr.bf16.mxu0 %v3211_v1 }
 0x193   : > { %2676 = vmatpush3.bf16.msra.mxu0 %v2832_v17 }
 0x194   : > { %2677 = vmatprep.subr.bf16.mxu0 %v3211_v1 }
 0x197   : > { %2678 = vmatpush3.bf16.msra.mxu0 %v2833_v18 }
 0x198   : > { %2679 = vmatprep.subr.bf16.mxu0 %v3211_v1 }
 0x19b   : > { %2680 = vmatpush3.bf16.msra.mxu0 %v2834_v19 }
 0x250   : > { %v1102_v55 = vpop.f32.mrb[0].mxu0  ;;  %v1145_v7 = vpop.f32.mrb[0].mxu1 }
 0x251   : > { %v1104_v23 = vpop.f32.mrb[1].mxu0  ;;  %v2639_v24 = vpop.f32.mrb[1].mxu1  ;;  %v1152_v31 = vmul.f32 0.088388346, %v1102_v55  ;;  %v1263_v32 = vpack.c.bf16 %v1145_v7, %v1145_v7 }
 0x252   : > { %v1156_v25 = vpack.c.bf16 %v1104_v23, %v1104_v23  ;;  %v1106_v26 = vpop.f32.mrb[2].mxu0  ;;  %v1148_v27 = vpop.f32.mrb[2].mxu1 }
 0x253   : > { %v1264_v28 = vpack.c.bf16 %v1148_v27, %v1148_v27  ;;  %v1108_v29 = vpop.f32.mrb[3].mxu0  ;;  %v2640_v30 = vpop.f32.mrb[3].mxu1  ;;  %v1154_v37 = vpack.c.bf16 %v1152_v31, %v1152_v31  ;;  %v1153_v42 = vmul.f32 0.088388346, %v1106_v26  ;;  %v1270_v44 = vsel %vm1268_vm1, %v1263_v32, 0 }
 0x254   : > { %2642 = vmatpush3.bf16.xpose.msra.mxu1 %v1156_v25  ;;  %v1157_v40 = vpack.c.bf16 %v1108_v29, %v1108_v29  ;;  %v2840_v32 = vld [vmem:[#allocation10 + $0xc] ss:$16 sps:$4 sm:$0xff]  }
 0x255   : > { %v3663_v36 = vsel %vm1268_vm1, %v1264_v28, 0  ;;  %2647 = vmatprep.subr.bf16.mxu1 %v3211_v1  ;;  %v1155_v33 = vpack.c.bf16 %v1153_v42, %v1153_v42  ;;  %v2838_v42 = vld [vmem:[#allocation10 + $0x8] ss:$16 sps:$4 sm:$0xff]   ;;  %1765 = vmatprep.subr.bf16.mxu0 %v2840_v32 }
 0x256   : > { %v2889_v32 = vld [vmem:[#allocation11 + $0x8] sm:$0xff]  }
 0x25b   : > { %2644 = vmatmul.mubr.bf16.vlgmr.msra.gmra.mrb[4].mxu1 %v1154_v37  ;;  %v2835_v37 = vld [vmem:[#allocation10] ss:$16 sps:$4 sm:$0xff]  }
 0x25c   : > { %2648 = vmatpush3.bf16.xpose.msra.mxu1 %v1157_v40  ;;  %2649 = vmatprep.mubr.msk.bf16.mxu1 %vm3213_vm0, %v3211_v1  ;;  %v2837_v40 = vld [vmem:[#allocation10 + $0x4] ss:$16 sps:$4 sm:$0xff]  }
 0x25d   : > { %2653 = vmatprep.subr.bf16.mxu1 %v3211_v1 }
 0x263   : > { %2650 = vmatmul.mubr.bf16.vlgmr.msra.gmra.mrb[8].mxu1 %v1155_v33  ;;  %v2843_v33 = vld [vmem:[#allocation10 + $0x24] ss:$16 sps:$4 sm:$0xff]  }
 0x264   : > { %2654 = vmatpush3.bf16.msra.mxu1 %v1270_v44  ;;  %2655 = vmatprep.mubr.msk.bf16.mxu1 %vm3213_vm0, %v3211_v1  ;;  %v2846_v44 = vld [vmem:[#allocation10 + $0x2c] ss:$16 sps:$4 sm:$0xff]  }
 0x265   : > { %2659 = vmatprep.subr.bf16.mxu1 %v3211_v1 }
 0x32e   : > { %v1192_v45 = vpop.f32.mrb[4].mxu1 }
 0x32f   : > { %v2645_v46 = vpop.f32.mrb[5].mxu1  ;;  %v1239_v47 = vsel %vm1238_vm2, %v1192_v45, -inf }
 0x330   : > { %1240 = vmax.xlane.f32.xlu0 %v1239_v47  ;;  %v1195_v38 = vpop.f32.mrb[6].mxu1 }
 0x331   : > { %v2646_v39 = vpop.f32.mrb[7].mxu1 }
 0x336   : > { %v1232_v51 = vpop.f32.mrb[8].mxu1 }
 0x337   : > { %v2651_v52 = vpop.f32.mrb[9].mxu1  ;;  %v1242_v53 = vsel %vm1238_vm2, %v1232_v51, -inf }
 0x338   : > { %1243 = vmax.xlane.f32.xlu1 %v1242_v53  ;;  %v1235_v54 = vpop.f32.mrb[10].mxu1  ;;  %v2849_v53 = vld [vmem:[#allocation10 + $0x44] ss:$16 sps:$4 sm:$0xff]  }
 0x339   : > { %v2652_v56 = vpop.f32.mrb[11].mxu1  ;;  %v2852_v54 = vld [vmem:[#allocation10 + $0x4c] ss:$16 sps:$4 sm:$0xff]  }
 0x33a   : > { %v2847_v56 = vld [vmem:[#allocation10 + $0x40] ss:$16 sps:$4 sm:$0xff]  }
 0x3bd   : > { %v1241_v57 = vpop.xlane.xlu0 %1240 }
 0x3be   : > { %v1245_v49 = vsub.f32 %v1192_v45, %v1241_v57  ;;  %v2850_v57 = vld [vmem:[#allocation10 + $0x48] ss:$16 sps:$4 sm:$0xff]  }
 0x3c0   : > { %v1247_v50 = vmul.f32 1.442695, %v1245_v49  ;;  %v2855_v49 = vld [vmem:[#allocation10 + $0x64] ss:$16 sps:$4 sm:$0xff]  }
 0x3c2   : > { %2915 = vpow2.f32 %v1247_v50  ;;  %v2858_v50 = vld [vmem:[#allocation10 + $0x6c] ss:$16 sps:$4 sm:$0xff]  }
 0x3c5   : > { %v1244_v58 = vpop.xlane.xlu1 %1243 }
 0x3c6   : > { %v1246_v59 = vsub.f32 %v1232_v51, %v1244_v58  ;;  %v2853_v58 = vld [vmem:[#allocation10 + $0x60] ss:$16 sps:$4 sm:$0xff]  }
 0x3c8   : > { %v1249_v60 = vmul.f32 1.442695, %v1246_v59  ;;  %v2856_v59 = vld [vmem:[#allocation10 + $0x68] ss:$16 sps:$4 sm:$0xff]  }
 0x3ca   : > { %2917 = vpow2.f32 %v1249_v60  ;;  %v2861_v60 = vld [vmem:[#allocation10 + $0x84] ss:$16 sps:$4 sm:$0xff]  }
 0x3cc   : > { %v2916_v61 = vpop.eup %2915 }
 0x3cd   : > { %v1251_v41 = vsel %vm1238_vm2, %v2916_v61, 0.0 }
 0x3ce   : > { %1252 = vadd.xlane.f32.xlu0 %v1251_v41  ;;  %v2859_v41 = vld [vmem:[#allocation10 + $0x80] ss:$16 sps:$4 sm:$0xff]  }
 0x3d4   : > { %v2918_v62 = vpop.eup %2917 }
 0x3d5   : > { %v1254_v63 = vsel %vm1238_vm2, %v2918_v62, 0.0 }
 0x3d6   : > { %1255 = vadd.xlane.f32.xlu0 %v1254_v63  ;;  %v2867_v63 = vld [vmem:[#allocation10 + $0xa4] ss:$16 sps:$4 sm:$0xff]  }
 0x45b   : > { %v1253_v9 = vpop.xlane.xlu0 %1252 }
 0x45c   : > { %2919 = vrcp.f32 %v1253_v9  ;;  %v2871_v9 = vld [vmem:[#allocation10 + $0xc0] ss:$16 sps:$4 sm:$0xff]  }
 0x463   : > { %v1256_v10 = vpop.xlane.xlu0 %1255 }
 0x464   : > { %2921 = vrcp.f32 %v1256_v10  ;;  %v2874_v10 = vld [vmem:[#allocation10 + $0xc8] ss:$16 sps:$4 sm:$0xff]  }
 0x466   : > { %v2920_v11 = vpop.eup %2919 }
 0x467   : > { %v1259_v12 = vmul.f32 %v2920_v11, %v2916_v61  ;;  %v2864_v61 = vld [vmem:[#allocation10 + $0x8c] ss:$16 sps:$4 sm:$0xff]   ;;  %v2879_v11 = vld [vmem:[#allocation10 + $0xe4] ss:$16 sps:$4 sm:$0xff]  }
 0x469   : > { %v1261_v13 = vpack.c.bf16 %v1259_v12, %v1259_v12  ;;  %v2882_v12 = vld [vmem:[#allocation10 + $0xec] ss:$16 sps:$4 sm:$0xff]  }
 0x46b   : > { %2656 = vmatmul.mubr.msk.bf16.vlgmr.msra.gmra.mrb[12].mxu1 %vm1238_vm2, %v1261_v13  ;;  %v2877_v13 = vld [vmem:[#allocation10 + $0xe0] ss:$16 sps:$4 sm:$0xff]  }
 0x46c   : > { %2660 = vmatpush3.bf16.msra.mxu1 %v3663_v36  ;;  %2661 = vmatprep.mubr.msk.bf16.mxu1 %vm3213_vm0, %v3211_v1 }
 0x46d   : > { %1722 = vmatprep.subr.bf16.mxu1 %v2837_v40  ;;  %v2887_v40 = vld [vmem:[#allocation11 + $0x48] sm:$0xff]  }
 0x46e   : > { %v2922_v15 = vpop.eup %2921 }
 0x46f   : > { %v1260_v48 = vmul.f32 %v2922_v15, %v2918_v62  ;;  %v2862_v62 = vld [vmem:[#allocation10 + $0x88] ss:$16 sps:$4 sm:$0xff]  }
 0x470   : > { %v2880_v15 = vld [vmem:[#allocation10 + $0xe8] ss:$16 sps:$4 sm:$0xff]  }
 0x471   : > { %v1262_v16 = vpack.c.bf16 %v1260_v48, %v1260_v48 }
 0x473   : > { %2662 = vmatmul.mubr.msk.bf16.vlgmr.msra.gmra.mrb[16].mxu1 %vm1238_vm2, %v1262_v16 }
 0x474   : > { %1754 = vmatprep.mubr.bf16.mxu1 %v3212_v14  ;;  %1723 = vmatpush1.bf16.msra.mxu1 %v2835_v37  ;;  %v2886_v37 = vld [vmem:[#allocation11 + $0x80] sm:$0xff]  }
 0x475   : > { %1724 = vmatprep.subr.bf16.mxu1 %v2843_v33  ;;  %v2890_v33 = vld [vmem:[#allocation11 + $0x88] sm:$0xff]  }
 0x53e   : > { %v1306_v20 = vpop.f32.mrb[12].mxu1 }
 0x53f   : > { %v2657_v2 = vpop.f32.mrb[13].mxu1 }
 0x540   : > { %v1309_v55 = vpop.f32.mrb[14].mxu1 }
 0x541   : > { %v2658_v7 = vpop.f32.mrb[15].mxu1  ;;  %v2476_v55 = vld [vmem:[%s3843_s4] ss:$0 sm:$0xff] }
 0x546   : > { %v1352_v23 = vpop.f32.mrb[16].mxu1 }
 0x547   : > { %v1358_v24 = vpack.c.bf16 %v1352_v23, %v1306_v20  ;;  %v2663_v25 = vpop.f32.mrb[17].mxu1 }
 0x548   : > { %v1355_v26 = vpop.f32.mrb[18].mxu1 }
 0x549   : > { %v2664_v27 = vpop.f32.mrb[19].mxu1  ;;  %2682 = vmatmul.mubr.bf16.vlgmr.msra.gmra.mrb[4].mxu0 %v1358_v24  ;;  %v2477_v26 = vld [vmem:[%s3844_s5] ss:$0 sm:$0xff] }
 0x54a   : > { %1797 = vmatprep.mubr.bf16.mxu0 %v3212_v14  ;;  %v2841_v14 = vld [vmem:[#allocation10 + $0x20] ss:$16 sps:$4 sm:$0xff]   ;;  %1766 = vmatpush1.bf16.msra.mxu0 %v2838_v42  ;;  %v2888_v42 = vld [vmem:[#allocation11 + $0xc8] sm:$0xff]  }
 0x54b   : > { %1767 = vmatprep.subr.bf16.mxu0 %v2846_v44  ;;  %1725 = vmatpush1.bf16.msra.mxu1 %v2841_v14  ;;  %v2891_v44 = vld [vmem:[#allocation11 + $0x50] sm:$0xff]  }
 0x54c   : > { %1726 = vmatprep.subr.bf16.mxu1 %v2849_v53  ;;  %v2892_v14 = vld [vmem:[#allocation11 + $0xd0] sm:$0xff]   ;;  %v2902_v53 = vld [vmem:[#allocation11 + $0xa0] sm:$0xff]  }
 0x54f   : > { %1727 = vmatpush1.bf16.msra.mxu1 %v2847_v56  ;;  %v2904_v56 = vld [vmem:[#allocation11 + $0xe8] sm:$0xff]  }
 0x550   : > { %1728 = vmatprep.subr.bf16.mxu1 %v2855_v49  ;;  %v2906_v49 = vld [vmem:[#allocation11 + $0xa8] sm:$0xff]  }
 0x553   : > { %1729 = vmatpush1.bf16.msra.mxu1 %v2853_v58  ;;  %v2908_v58 = vld [vmem:[#allocation11 + $0xf0] sm:$0xff]  }
 0x554   : > { %1730 = vmatprep.subr.bf16.mxu1 %v2861_v60  ;;  %v2910_v60 = vld [vmem:[#allocation11 + $0xb0] sm:$0xff]  }
 0x557   : > { %1731 = vmatpush1.bf16.msra.mxu1 %v2859_v41  ;;  %v2912_v41 = vld [vmem:[#allocation11 + $0xf8] sm:$0xff]  }
 0x558   : > { %1732 = vmatprep.subr.bf16.mxu1 %v2867_v63  ;;  %v2914_v63 = vld [vmem:[#allocation11 + $0xb8] sm:$0xff]  }
 0x55b   : > { %1733 = vmatpush1.bf16.msra.mxu1 %v2865_v4 }
 0x55c   : > { %1734 = vmatprep.subr.bf16.mxu1 %v2873_v8 }
 0x55f   : > { %1735 = vmatpush1.bf16.msra.mxu1 %v2871_v9 }
 0x560   : > { %1736 = vmatprep.subr.bf16.mxu1 %v2879_v11 }
 0x563   : > { %1737 = vmatpush1.bf16.msra.mxu1 %v2877_v13 }
 0x61c   : > { %v1457_v28 = vpop.f32.mrb[4].mxu0 }
 0x61d   : > { %v1464_v29 = vadd.f32 %v1457_v28, %v3655_v22  ;;  %v2683_v30 = vpop.f32.mrb[5].mxu0  ;;  %v2844_v22 = vld [vmem:[#allocation10 + $0x28] ss:$16 sps:$4 sm:$0xff]  }
 0x61e   : > { %v1460_v31 = vpop.f32.mrb[6].mxu0  ;;  %1768 = vmatpush1.bf16.msra.mxu0 %v2844_v22  ;;  %v2893_v22 = vld [vmem:[#allocation11 + $0x10] sm:$0xff]  }
 0x61f   : > { %v1465_v1 = vadd.f32 %v1460_v31, %v3653_v21  ;;  %1468 = vadd.xlane.f32.xlu1 %v1464_v29  ;;  %v2684_v36 = vpop.f32.mrb[7].mxu0  ;;  %1769 = vmatprep.subr.bf16.mxu0 %v2852_v54  ;;  %v2883_v31 = vld [vmem:[#allocation11 + $0x40] sm:$0xff]   ;;  %v2903_v54 = vld [vmem:[#allocation11 + $0x68] sm:$0xff]  }
 0x620   : > { %v2885_v36 = vld [vmem:[#allocation11] sm:$0xff]   ;;  %2577 = vmatprep.subr.bf16.mxu1 %v2883_v31 }
 0x621   : > { %1470 = vadd.xlane.f32.xlu0 %v1465_v1 }
 0x622   : > { %1770 = vmatpush1.bf16.msra.mxu0 %v2850_v57  ;;  %v2905_v57 = vld [vmem:[#allocation11 + $0x28] sm:$0xff]  }
 0x623   : > { %1771 = vmatprep.subr.bf16.mxu0 %v2858_v50  ;;  %v2907_v50 = vld [vmem:[#allocation11 + $0x70] sm:$0xff]  }
 0x626   : > { %1772 = vmatpush1.bf16.msra.mxu0 %v2856_v59  ;;  %v2909_v59 = vld [vmem:[#allocation11 + $0x30] sm:$0xff]  }
 0x627   : > { %1773 = vmatprep.subr.bf16.mxu0 %v2864_v61  ;;  %v2911_v61 = vld [vmem:[#allocation11 + $0x78] sm:$0xff]  }
 0x62a   : > { %1774 = vmatpush1.bf16.msra.mxu0 %v2862_v62  ;;  %v2913_v62 = vld [vmem:[#allocation11 + $0x38] sm:$0xff]  }
 0x62b   : > { %1775 = vmatprep.subr.bf16.mxu0 %v2870_v0  ;;  %v1540_v0 = vld [vmem:[%s3846_s7] sm:$0xf] }
 0x62c   : > { %v1545_v4 = vrot.slane %v1540_v0, %v3536_v3  ;;  %v1549_v8 = vrot.slane %v1540_v0, %v3543_v5 }
 0x62e   : > { %1776 = vmatpush1.bf16.msra.mxu0 %v2868_v6  ;;  %v1553_v6 = vrot.slane %v1540_v0, %v3628_v34 }
 0x62f   : > { %1777 = vmatprep.subr.bf16.mxu0 %v2876_v43  ;;  %v1557_v43 = vrot.slane %v1540_v0, %v3631_v35 }
 0x632   : > { %1778 = vmatpush1.bf16.msra.mxu0 %v2874_v10 }
 0x633   : > { %1779 = vmatprep.subr.bf16.mxu0 %v2882_v12 }
 0x636   : > { %1780 = vmatpush1.bf16.msra.mxu0 %v2880_v15 }
 0x6ac   : > { %v1469_v21 = vpop.xlane.xlu1 %1468 }
 0x6ad   : > { %v1473_v45 = vmul.f32 0.0078125, %v1469_v21  ;;  %v2894_v21 = vld [vmem:[#allocation11 + $0x90] sm:$0xff]  }
 0x6ae   : > { %v1471_v46 = vpop.xlane.xlu0 %1470 }
 0x6af   : > { %v3692_v47 = vsub.f32 %v1464_v29, %v1473_v45  ;;  %v1474_v38 = vmul.f32 0.0078125, %v1471_v46  ;;  %v2895_v45 = vld [vmem:[#allocation11 + $0x58] sm:$0xff]  }
 0x6b0   : > { %v2896_v46 = vld [vmem:[#allocation11 + $0xd8] sm:$0xff]  }
 0x6b1   : > { %v3694_v39 = vsub.f32 %v1465_v1, %v1474_v38  ;;  %v1477_v51 = vmul.f32 %v3692_v47, %v3692_v47  ;;  %v2884_v1 = vld [vmem:[#allocation11 + $0xc0] sm:$0xff]   ;;  %v2898_v38 = vld [vmem:[#allocation11 + $0x98] sm:$0xff]  }
 0x6b2   : > { %2599 = vmatprep.subr.bf16.mxu0 %v2884_v1 }
 0x6b3   : > { %1479 = vadd.xlane.f32.xlu1 %v1477_v51  ;;  %v1478_v52 = vmul.f32 %v3694_v39, %v3694_v39  ;;  %v2900_v51 = vld [vmem:[#allocation11 + $0xe0] sm:$0xff]  }
 0x6b5   : > { %1481 = vadd.xlane.f32.xlu0 %v1478_v52  ;;  %v2901_v52 = vld [vmem:[#allocation11 + $0x20] sm:$0xff]  }
 0x740   : > { %v1480_v48 = vpop.xlane.xlu1 %1479 }
 0x741   : > { %v1483_v16 = vmul.f32 0.0078125, %v1480_v48 }
 0x742   : > { %v1482_v17 = vpop.xlane.xlu0 %1481 }
 0x743   : > { %v1485_v18 = vadd.f32 1e-05, %v1483_v16  ;;  %v1484_v19 = vmul.f32 0.0078125, %v1482_v17 }
 0x745   : > { %2923 = vrsqrt.f32 %v1485_v18  ;;  %v1486_v20 = vadd.f32 1e-05, %v1484_v19 }
 0x747   : > { %2925 = vrsqrt.f32 %v1486_v20 }
 0x74f   : > { %v2924_v2 = vpop.eup %2923 }
 0x750   : > { %v1489_v7 = vmul.f32 %v2924_v2, %v3692_v47  ;;  %v2897_v47 = vld [vmem:[#allocation11 + $0x18] sm:$0xff]  }
 0x751   : > { %v2926_v23 = vpop.eup %2925 }
 0x752   : > { %v1490_v24 = vmul.f32 %v2926_v23, %v3694_v39  ;;  %v1497_v25 = vmul.f32 %v2476_v55, %v1489_v7  ;;  %v2899_v39 = vld [vmem:[#allocation11 + $0x60] sm:$0xff]  }
 0x754   : > { %v1498_v27 = vmul.f32 %v2476_v55, %v1490_v24  ;;  %v3708_v28 = vadd.f32 %v2477_v26, %v1497_v25 }
 0x756   : > { %v3710_v29 = vadd.f32 %v2477_v26, %v1498_v27 }
 0x758   : > { %v1507_v30 = vpack.c.bf16 %v3710_v29, %v3708_v28 }
 0x75a   : > { %1755 = vmatmul.mubr.bf16.vlgmr.msra.gmra.mrb[20].mxu1 %v1507_v30  ;;  %1798 = vmatmul.mubr.bf16.vlgmr.msra.gmra.mrb[8].mxu0 %v1507_v30 }
 0x75b   : > { %2578 = vmatpush3.bf16.msra.mxu1 %v2885_v36  ;;  %2600 = vmatpush3.bf16.msra.mxu0 %v2886_v37 }
 0x75c   : > { %2579 = vmatprep.subr.bf16.mxu1 %v2887_v40  ;;  %2601 = vmatprep.subr.bf16.mxu0 %v2888_v42 }
 0x75f   : > { %2580 = vmatpush3.bf16.msra.mxu1 %v2889_v32  ;;  %2602 = vmatpush3.bf16.msra.mxu0 %v2890_v33 }
 0x760   : > { %2581 = vmatprep.subr.bf16.mxu1 %v2891_v44  ;;  %2603 = vmatprep.subr.bf16.mxu0 %v2892_v14 }
 0x763   : > { %2582 = vmatpush3.bf16.msra.mxu1 %v2893_v22  ;;  %2604 = vmatpush3.bf16.msra.mxu0 %v2894_v21 }
 0x764   : > { %2583 = vmatprep.subr.bf16.mxu1 %v2895_v45  ;;  %2605 = vmatprep.subr.bf16.mxu0 %v2896_v46 }
 0x767   : > { %2584 = vmatpush3.bf16.msra.mxu1 %v2897_v47  ;;  %2606 = vmatpush3.bf16.msra.mxu0 %v2898_v38 }
 0x768   : > { %2585 = vmatprep.subr.bf16.mxu1 %v2899_v39  ;;  %2607 = vmatprep.subr.bf16.mxu0 %v2900_v51 }
 0x76b   : > { %2586 = vmatpush3.bf16.msra.mxu1 %v2901_v52  ;;  %2608 = vmatpush3.bf16.msra.mxu0 %v2902_v53 }
 0x76c   : > { %2587 = vmatprep.subr.bf16.mxu1 %v2903_v54  ;;  %2609 = vmatprep.subr.bf16.mxu0 %v2904_v56 }
 0x76f   : > { %2588 = vmatpush3.bf16.msra.mxu1 %v2905_v57  ;;  %2610 = vmatpush3.bf16.msra.mxu0 %v2906_v49 }
 0x770   : > { %2589 = vmatprep.subr.bf16.mxu1 %v2907_v50  ;;  %2611 = vmatprep.subr.bf16.mxu0 %v2908_v58 }
 0x773   : > { %2590 = vmatpush3.bf16.msra.mxu1 %v2909_v59  ;;  %2612 = vmatpush3.bf16.msra.mxu0 %v2910_v60 }
 0x774   : > { %2591 = vmatprep.subr.bf16.mxu1 %v2911_v61  ;;  %2613 = vmatprep.subr.bf16.mxu0 %v2912_v41 }
 0x777   : > { %2592 = vmatpush3.bf16.msra.mxu1 %v2913_v62  ;;  %2614 = vmatpush3.bf16.msra.mxu0 %v2914_v63 }
 0x82d   : > { %v1756_v9 = vpop.f32.mrb[20].mxu1  ;;  %v1799_v10 = vpop.f32.mrb[8].mxu0 }
 0x82e   : > { %v3721_v11 = vadd.f32 %v1756_v9, %v1545_v4  ;;  %v3723_v12 = vadd.f32 %v1799_v10, %v1553_v6  ;;  %v1758_v13 = vpop.f32.mrb[21].mxu1  ;;  %v1801_v15 = vpop.f32.mrb[9].mxu0 }
 0x82f   : > { %v3725_v48 = vadd.f32 %v1758_v13, %v1549_v8  ;;  %v3727_v16 = vadd.f32 %v1801_v15, %v1557_v43  ;;  %v1760_v17 = vpop.f32.mrb[22].mxu1  ;;  %v1803_v3 = vpop.f32.mrb[10].mxu0 }
 0x830   : > { %v1808_v34 = vmul.f32 %v3721_v11, %v3721_v11  ;;  %v1810_v5 = vmul.f32 %v3723_v12, %v3723_v12  ;;  %v3733_v35 = vadd.f32 %v1760_v17, %v1545_v4  ;;  %v3735_v18 = vadd.f32 %v1803_v3, %v1553_v6  ;;  %v1762_v19 = vpop.f32.mrb[23].mxu1  ;;  %v1805_v20 = vpop.f32.mrb[11].mxu0 }
 0x831   : > { %v1809_v2 = vmul.f32 %v3725_v48, %v3725_v48  ;;  %v1811_v55 = vmul.f32 %v3727_v16, %v3727_v16  ;;  %v3741_v7 = vadd.f32 %v1762_v19, %v1549_v8  ;;  %v3743_v23 = vadd.f32 %v1805_v20, %v1557_v43 }
 0x832   : > { %v1816_v24 = vmul.f32 %v1808_v34, %v3721_v11  ;;  %v1818_v25 = vmul.f32 %v1810_v5, %v3723_v12  ;;  %v1812_v26 = vmul.f32 %v3733_v35, %v3733_v35  ;;  %v1814_v27 = vmul.f32 %v3735_v18, %v3735_v18 }
 0x833   : > { %v1817_v30 = vmul.f32 %v1809_v2, %v3725_v48  ;;  %v1819_v31 = vmul.f32 %v1811_v55, %v3727_v16  ;;  %v1813_v1 = vmul.f32 %v3741_v7, %v3741_v7  ;;  %v1815_v36 = vmul.f32 %v3743_v23, %v3743_v23 }
 0x834   : > { %v1824_v37 = vmul.f32 0.044715, %v1816_v24  ;;  %v1826_v40 = vmul.f32 0.044715, %v1818_v25  ;;  %v1820_v42 = vmul.f32 %v1812_v26, %v3733_v35  ;;  %v1822_v32 = vmul.f32 %v1814_v27, %v3735_v18 }
 0x835   : > { %v1825_v33 = vmul.f32 0.044715, %v1817_v30  ;;  %v1827_v44 = vmul.f32 0.044715, %v1819_v31  ;;  %v1821_v14 = vmul.f32 %v1813_v1, %v3741_v7  ;;  %v1823_v22 = vmul.f32 %v1815_v36, %v3743_v23 }
 0x836   : > { %v1832_v21 = vadd.f32 %v1824_v37, %v3721_v11  ;;  %v1834_v45 = vadd.f32 %v1826_v40, %v3723_v12  ;;  %v1828_v46 = vmul.f32 0.044715, %v1820_v42  ;;  %v1830_v47 = vmul.f32 0.044715, %v1822_v32 }
 0x837   : > { %v1833_v38 = vadd.f32 %v1825_v33, %v3725_v48  ;;  %v1835_v39 = vadd.f32 %v1827_v44, %v3727_v16  ;;  %v1829_v51 = vmul.f32 0.044715, %v1821_v14  ;;  %v1831_v52 = vmul.f32 0.044715, %v1823_v22 }
 0x838   : > { %v1840_v53 = vmul.f32 0.7978846, %v1832_v21  ;;  %v1842_v54 = vmul.f32 0.7978846, %v1834_v45  ;;  %v1836_v56 = vadd.f32 %v1828_v46, %v3733_v35  ;;  %v1838_v57 = vadd.f32 %v1830_v47, %v3735_v18 }
 0x839   : > { %v1841_v49 = vmul.f32 0.7978846, %v1833_v38  ;;  %v1843_v50 = vmul.f32 0.7978846, %v1835_v39  ;;  %v1837_v58 = vadd.f32 %v1829_v51, %v3741_v7  ;;  %v1839_v59 = vadd.f32 %v1831_v52, %v3743_v23 }
 0x83a   : > { %2927 = vtanh.f32 %v1840_v53  ;;  %v1844_v60 = vmul.f32 0.7978846, %v1836_v56  ;;  %v1846_v61 = vmul.f32 0.7978846, %v1838_v57 }
 0x83b   : > { %2929 = vtanh.f32 %v1842_v54  ;;  %v1845_v41 = vmul.f32 0.7978846, %v1837_v58  ;;  %v1847_v62 = vmul.f32 0.7978846, %v1839_v59 }
 0x83c   : > { %2931 = vtanh.f32 %v1841_v49 }
 0x83d   : > { %2933 = vtanh.f32 %v1843_v50 }
 0x83e   : > { %2935 = vtanh.f32 %v1844_v60 }
 0x83f   : > { %2937 = vtanh.f32 %v1846_v61 }
 0x840   : > { %2939 = vtanh.f32 %v1845_v41 }
 0x841   : > { %2941 = vtanh.f32 %v1847_v62 }
 0x844   : > { %v2928_v63 = vpop.eup %2927 }
 0x845   : > { %v2930_v0 = vpop.eup %2929  ;;  %v1856_v4 = vadd.f32 1.0, %v2928_v63 }
 0x846   : > { %v2932_v6 = vpop.eup %2931  ;;  %v1858_v8 = vadd.f32 1.0, %v2930_v0 }
 0x847   : > { %v2934_v43 = vpop.eup %2933  ;;  %v1857_v9 = vadd.f32 1.0, %v2932_v6  ;;  %v1864_v17 = vmul.f32 0.5, %v1856_v4 }
 0x848   : > { %v2936_v10 = vpop.eup %2935  ;;  %v1859_v13 = vadd.f32 1.0, %v2934_v43  ;;  %v1866_v5 = vmul.f32 0.5, %v1858_v8 }
 0x849   : > { %v2938_v15 = vpop.eup %2937  ;;  %v1860_v3 = vadd.f32 1.0, %v2936_v10  ;;  %v1865_v24 = vmul.f32 0.5, %v1857_v9  ;;  %v1872_v30 = vmul.f32 %v1864_v17, %v3721_v11  ;;  %v2543_v9 = vld [vmem:[%s3882_s28] ss:$0 sm:$0xff]  ;;  %s3117_s28 = scalar_lea.vmem %s3795_s15, 256 }
 0x84a   : > { %v2940_v34 = vpop.eup %2939  ;;  %v1862_v19 = vadd.f32 1.0, %v2938_v15  ;;  %v1867_v27 = vmul.f32 0.5, %v1859_v13  ;;  %v1874_v36 = vmul.f32 %v1866_v5, %v3723_v12  ;;  %v2544_v15 = vld [vmem:[%s3883_s9] ss:$0 sm:$0xff]  ;;  %p3118_p2 = scmp.ne.s32.totalorder %s3795_s15, %s3117_s28  ;;  %p3125_p12 = scmp.lt.s32.totalorder %s3123_s29, %s3117_s28 }
 0x84b   : > { %v2942_v20 = vpop.eup %2941  ;;  %v1868_v2 = vmul.f32 0.5, %v1860_v3  ;;  %v1861_v55 = vadd.f32 1.0, %v2940_v34  ;;  %v1873_v42 = vmul.f32 %v1865_v24, %v3725_v48  ;;  %v2510_v48 = vld [vmem:[%s3881_s30] ss:$0 sm:$0xff] }
 0x84c   : > { %v1870_v25 = vmul.f32 0.5, %v1862_v19  ;;  %v1863_v26 = vadd.f32 1.0, %v2942_v20  ;;  %v1875_v44 = vmul.f32 %v1867_v27, %v3727_v16  ;;  %p3119_p10 = pnand %p3118_p2, %p3885_p7  ;;  %p3126_p13 = por %p3125_p12, %p3124_p11 }
 0x84d   : > { %v1876_v31 = vmul.f32 %v1868_v2, %v3733_v35  ;;  %v1869_v1 = vmul.f32 0.5, %v1861_v55 }
 0x84e   : > { %v1878_v37 = vmul.f32 %v1870_v25, %v3735_v18  ;;  %v1871_v40 = vmul.f32 0.5, %v1863_v26  ;;  %p3120_p1 = pneg %p3119_p10 }
 0x84f   : > { %v1877_v32 = vmul.f32 %v1869_v1, %v3741_v7  ;;  %v1880_v33 = vpack.c.bf16 %v1876_v31, %v1872_v30 }
 0x850   : > { %v1879_v14 = vmul.f32 %v1871_v40, %v3743_v23  ;;  %v1882_v22 = vpack.c.bf16 %v1878_v37, %v1874_v36  ;;  %p3127_p3 = pnand %p3126_p13, %p3120_p1 }
 0x851   : > { %v1881_v21 = vpack.c.bf16 %v1877_v32, %v1873_v42 }
 0x852   : > { %v1883_v11 = vpack.c.bf16 %v1879_v14, %v1875_v44 }
 0x853   : > { %2179 = vmatprep.mubr.bf16.mxu1 %v1881_v21 }
 0x854   : > { %2220 = vmatprep.mubr.bf16.mxu0 %v1883_v11  ;;  %2180 = vmatmul.mubr.bf16.vlgmr.msra.gmra.mrb[24].mxu1 %v1880_v33 }
 0x855   : > { %2221 = vmatmul.mubr.bf16.vlgmr.msra.gmra.mrb[12].mxu0 %v1882_v22 }
 0x927   : > { %v2593_v12 = vpop.f32.mrb[24].mxu1 }
 0x928   : > { %v2615_v35 = vpop.f32.mrb[12].mxu0  ;;  %v2594_v18 = vpop.f32.mrb[25].mxu1 }
 0x929   : > { %v2595_v7 = vadd.f32 %v2594_v18, %v2593_v12  ;;  %v2616_v45 = vpop.f32.mrb[13].mxu0  ;;  %v2596_v46 = vpop.f32.mrb[26].mxu1 }
 0x92a   : > { %v2617_v16 = vadd.f32 %v2616_v45, %v2615_v35  ;;  %v2618_v47 = vpop.f32.mrb[14].mxu0  ;;  %v2597_v23 = vpop.f32.mrb[27].mxu1 }
 0x92b   : > { %v2182_v38 = vadd.f32 %v2595_v7, %v2510_v48  ;;  %v2598_v39 = vadd.f32 %v2597_v23, %v2596_v46  ;;  %v2619_v51 = vpop.f32.mrb[15].mxu0 }
 0x92c   : > { %v2620_v52 = vadd.f32 %v2619_v51, %v2618_v47 }
 0x92d   : > { %v2223_v53 = vadd.f32 %v2617_v16, %v2182_v38  ;;  %v2185_v54 = vadd.f32 %v2598_v39, %v2510_v48 }
 0x92f   : > { %v2226_v56 = vadd.f32 %v2620_v52, %v2185_v54  ;;  %v2229_v57 = vadd.f32 %v2223_v53, %v3708_v28 }
 0x931   : > { %2233 = vadd.xlane.f32.xlu1 %v2229_v57  ;;  %v2230_v49 = vadd.f32 %v2226_v56, %v3710_v29 }
 0x933   : > { %2235 = vadd.xlane.f32.xlu0 %v2230_v49 }
 0x9be   : > { %v2234_v50 = vpop.xlane.xlu1 %2233 }
 0x9bf   : > { %v2237_v58 = vmul.f32 0.0078125, %v2234_v50 }
 0x9c0   : > { %v2236_v59 = vpop.xlane.xlu0 %2235 }
 0x9c1   : > { %v2239_v60 = vsub.f32 %v2229_v57, %v2237_v58  ;;  %v2238_v61 = vmul.f32 0.0078125, %v2236_v59 }
 0x9c3   : > { %v2240_v41 = vsub.f32 %v2230_v49, %v2238_v61  ;;  %v2241_v62 = vmul.f32 %v2239_v60, %v2239_v60 }
 0x9c5   : > { %2243 = vadd.xlane.f32.xlu1 %v2241_v62  ;;  %v2242_v63 = vmul.f32 %v2240_v41, %v2240_v41 }
 0x9c7   : > { %2245 = vadd.xlane.f32.xlu0 %v2242_v63 }
 0xa52   : > { %v2244_v0 = vpop.xlane.xlu1 %2243 }
 0xa53   : > { %v2247_v4 = vmul.f32 0.0078125, %v2244_v0 }
 0xa54   : > { %v2246_v6 = vpop.xlane.xlu0 %2245 }
 0xa55   : > { %v2249_v28 = vadd.f32 1e-05, %v2247_v4  ;;  %v2248_v8 = vmul.f32 0.0078125, %v2246_v6 }
 0xa57   : > { %2943 = vrsqrt.f32 %v2249_v28  ;;  %v2250_v29 = vadd.f32 1e-05, %v2248_v8 }
 0xa59   : > { %2945 = vrsqrt.f32 %v2250_v29 }
 0xa61   : > { %v2944_v43 = vpop.eup %2943 }
 0xa62   : > { %v2253_v10 = vmul.f32 %v2944_v43, %v2239_v60 }
 0xa63   : > { %v2946_v13 = vpop.eup %2945 }
 0xa64   : > { %v2261_v17 = vmul.f32 %v2543_v9, %v2253_v10  ;;  %v2254_v3 = vmul.f32 %v2946_v13, %v2240_v41 }
 0xa66   : > { %v2269_v34 = vadd.f32 %v2544_v15, %v2261_v17  ;;  %v2262_v5 = vmul.f32 %v2543_v9, %v2254_v3 }
 0xa68   : > { %v2270_v19 = vadd.f32 %v2544_v15, %v2262_v5  ;;  %2271 = vst [vmem:[%s501_s12] sm:$0xff] %v2269_v34 }
 0xa6a   : > { %2272 = vst [vmem:[%s501_s12 + $0x8] sm:$0xff] %v2270_v19 }
 0xa6b   : > { %3130 = shalt.err (!%p3127_p3)
}
 0xa6c   : > { %s3131_s11 = scalar_lea.hbm %s3793_s10, 256  ;;  %s3135_s12 = scalar_lea.hbm %s3884_s0, 512 }
 0xa6d   : > { %p3132_p6 = scmp.ne.s32.totalorder %s3793_s10, %s3131_s11  ;;  %p3136_p8 = scmp.lt.u32.totalorder %s3793_s10, %s3884_s0 }
 0xa6e   : > { %p3137_p0 = scmp.lt.u32.totalorder %s3135_s12, %s3131_s11  ;;  %p3139_p2 = scmp.lt.u32.totalorder %s3131_s11, %s3793_s10 }
 0xa6f   : > { %p3133_p9 = pnand %p3132_p6, %p3885_p7 }
 0xa70   : > { %p3138_p5 = por %p3137_p0, %p3136_p8 }
 0xa71   : > { %p3134_p4 = pneg %p3133_p9 }
 0xa72   : > { %p3140_p10 = por %p3139_p2, %p3138_p5 }
 0xa74   : > { %p3141_p1 = pnand %p3140_p10, %p3134_p4 }
 0xa76   : > { %3144 = shalt.err (!%p3141_p1)
}
 0xa77   : > { %s3215_s28 = smov 128   ;;  %s3216_s27 = smov 8  }
 0xa78   : > { %2707 = dma.vmem_to_hbm [thread:$0]  (%p3885_p7), %s3795_s15, 256, %s3793_s10, %s2274_s14, %s3215_s28, %s3215_s28, %s3216_s27  }
 0xa79 PF: > { %s2302_s19 = sand.u32 1, %s3183_s21   ;;  %p3886_p11 = scmp.ne.s32.totalorder %s3871_s16, 0 }
 0xa7a   : > { %p3887_p12 = scmp.ge.s32.totalorder %s3195_s24, 2  ;;  %s2303_s29 = scalar_lea.sflag [#allocation4], %s2302_s19 }
 0xa7c   : > { %p2730_p13 = pnand %p3887_p12, %p3886_p11 }
 0xa7e   : > { %3178 = dma.done.wait (!%p2730_p13), %s2303_s29, 256  }
 0xa7f   : > { %3180 = vsyncadd (!%p2730_p13), %s2303_s29, 4294967040  ;;  %p28_p3 = scmp.ge.s32.totalorder %s3442_s25, 4   ;;  %s3888_s21 = smov %s3187_s22 }
 0xa80   : > { %s3889_s22 = smov %s3191_s23  ;;  %s3890_s23 = smov %s3454_s20 }
 0xa81   : > { %s3891_s24 = smov %s3442_s25  ;;  %30 = sbr.rel (!%p28_p3) target bundleno = 14 (0xe), region = 133 }
 0xa88   :  { %2308 = vsyncpa [#allocation3], 1 }
 0xa89   :  { %2310 = vsyncpa [#allocation3 + $0x1], 1 }
 0xa8a   :  { %2311 = vsyncpa [#allocation6], 1 }
 0xa8b   :  { %2312 = vsyncpa [#allocation9], 1 }
 0xa8c   :  { %2313 = vsyncpa [#allocation12], 1 }
 0xa8d   :  { %2314 = vsyncpa [#allocation4], 1 }
 0xa8e   :  { %2316 = vsyncpa [#allocation4 + $0x1], 1 }

</bundles_post_ra>
